<compile_context>
chip_gen: v6e
topology: v6e:2x2x1
jax: 0.10.0
libtpu: 0.0.40
codegen_flags: <defaults>
</compile_context>

<pallas_src>
import jax
import jax.numpy as jnp
from jax.experimental import pallas as pl
from jax.experimental.pallas import tpu as pltpu


def lexer_kernel(x_ref, w_ref, b_ref, seg_ref, out_ref, acc_ref):
    t = pl.program_id(0)

    @pl.when(t == 0)
    def _init():
        acc_ref[...] = jnp.zeros_like(acc_ref)

    # h = tanh(X @ W^T + b): bf16 MXU matmul (contract dim 1 of both operands, no
    # host-side transpose) with f32 accumulation; bias add + tanh in f32 (v5e-safe).
    h = jax.lax.dot_general(
        x_ref[...],                     # (tk, d_bpe)        bf16
        w_ref[...],                     # (d_word, d_bpe)    bf16 (resident)
        (((1,), (1,)), ((), ())),
        preferred_element_type=jnp.float32,
    )                                   # (tk, d_word) f32
    h = jnp.tanh(h + b_ref[...])

    # Build the word-assignment block of S on-chip: S[r, t] = (r == seg_id[t]).
    # Padding / dangling-'@@' tokens carry seg_id = -1 and match no row.  The 0/1
    # block is exact in bf16, so the segment-sum matmul runs on the native bf16 MXU
    # path (f32 accumulate) instead of multi-pass f32 emulation.
    seg = seg_ref[...]                  # (1, tk) int32
    row_ids = jax.lax.broadcasted_iota(
        jnp.int32, (acc_ref.shape[0], seg.shape[-1]), 0)     # (n_rows, tk)
    s_blk = (row_ids == seg).astype(jnp.bfloat16)

    # Segment sum for this token tile, accumulated over the reduction grid axis.
    acc_ref[...] += jnp.dot(s_blk, h.astype(jnp.bfloat16),
                            preferred_element_type=jnp.float32)

    @pl.when(t == pl.num_programs(0) - 1)
    def _done():
        out_ref[...] = acc_ref[...].astype(out_ref.dtype)


def averaging_bpe_lexer(bpe_embeds_flat, W, b, seg_ids_flat, *, n_rows, tk=512):
    """Flattened-stream word aggregation.

    bpe_embeds_flat: (N, d_bpe) f32  -- all sentences' BPE vectors back-to-back.
    W: (d_word, d_bpe) f32, b: (d_word,) f32   -- the Linear(bpe -> word) params.
    seg_ids_flat: (N,) int32 -- global output-row id per token
                  (= sentence_idx * n_words_pad + word_idx; -1 = dropped/padding).
    n_rows: B * n_words_pad (multiple of 8).
    Returns (n_rows, d_word) f32; reshape to (B, n_words_pad, d_word) on the host.
    """
    N, d_bpe = bpe_embeds_flat.shape
    d_word = W.shape[0]
    assert tk % 128 == 0
    assert d_bpe % 128 == 0 and d_word % 128 == 0 and n_rows % 8 == 0

    # Pad the token stream to a multiple of tk (padding tokens match no row).
    pad = (-N) % tk
    if pad:
        bpe_embeds_flat = jnp.pad(bpe_embeds_flat, ((0, pad), (0, 0)))
        seg_ids_flat = jnp.pad(seg_ids_flat, (0, pad), constant_values=-1)
    N_pad = N + pad
    n_t = N_pad // tk

    x_bf = bpe_embeds_flat.astype(jnp.bfloat16)     # halve HBM traffic, MXU-native
    w_bf = W.astype(jnp.bfloat16)                   # fed untransposed (dot_general)
    b2 = b.reshape(1, d_word).astype(jnp.float32)
    seg2 = seg_ids_flat.reshape(1, N_pad).astype(jnp.int32)

    return pl.pallas_call(
        lexer_kernel,
        out_shape=jax.ShapeDtypeStruct((n_rows, d_word), jnp.float32),
        grid_spec=pltpu.PrefetchScalarGridSpec(
            num_scalar_prefetch=0,
            grid=(n_t,),                                          # reduction axis only
            in_specs=[
                pl.BlockSpec((tk, d_bpe), lambda ti: (ti, 0)),    # streamed X tiles
                pl.BlockSpec((d_word, d_bpe), lambda ti: (0, 0)), # resident weight
                pl.BlockSpec((1, d_word), lambda ti: (0, 0)),     # resident bias
                pl.BlockSpec((1, tk), lambda ti: (0, ti)),        # seg ids (int32)
            ],
            out_specs=pl.BlockSpec((n_rows, d_word), lambda ti: (0, 0)),
            scratch_shapes=[pltpu.VMEM((n_rows, d_word), jnp.float32)],
        ),
        compiler_params=pltpu.CompilerParams(
            dimension_semantics=("arbitrary",),
        ),
    )(x_bf, w_bf, b2, seg2)


def build_segment_ids(sentences, n_words_pad, n_total):
    """Mirror the Python '@@' merging loop on the flattened token stream.

    Each token gets the global output row of its word (sentence_idx * n_words_pad +
    word_idx).  Tokens of a dangling trailing '@@' word and padding positions get -1,
    so they are assigned to no output row -- matching the PyTorch forward, which never
    emits the unflushed emb_buffer."""
    seg, n_words = [], []
    for bi, toks in enumerate(sentences):
        ids, wid = [], 0
        for tok in toks:
            ids.append(wid)
            if not tok.endswith("@@"):
                wid += 1
        if wid > n_words_pad:
            raise ValueError("sentence has more words than n_words_pad")
        seg.extend(bi * n_words_pad + i if i < wid else -1 for i in ids)
        n_words.append(wid)
    seg += [-1] * (n_total - len(seg))
    return jnp.array(seg, dtype=jnp.int32), n_words


def reference(bpe_embeds_flat, W, b, seg_flat, n_rows):
    """Pure-JAX reference of the PyTorch forward, applying the same bf16 roundings as
    the kernel (bf16 X/W into the projection, bf16 h into the exact 0/1 segment sum)."""
    xb = bpe_embeds_flat.astype(jnp.bfloat16)
    wb = W.astype(jnp.bfloat16)
    h = jnp.einsum("tk,dk->td", xb, wb, preferred_element_type=jnp.float32)
    h = jnp.tanh(h + b[None, :])
    h = h.astype(jnp.bfloat16).astype(jnp.float32)       # kernel's S-matmul rounding
    s = (jnp.arange(n_rows, dtype=jnp.int32)[:, None]
         == seg_flat[None, :]).astype(jnp.float32)
    return jnp.einsum("wt,td->wd", s, h, precision=jax.lax.Precision.HIGHEST)


if __name__ == "__main__":
    # Small shapes consistent with the module (real module: bpe 1024 -> word 256).
    bpe_dim, word_dim = 256, 256
    tk = 512                    # token tile (review: 512-1024; lane/sublane aligned)
    n_words_pad = 8             # word rows per sentence (padded)
    sentences = [
        ["the", "quick@@", "ly", "bro@@", "wn@@", "fox", "jum@@", "ps"],
        ["a", "sen@@", "tence", "with", "trail@@", "ing@@"],   # dangling '@@' word
    ]
    B = len(sentences)
    n_rows = B * n_words_pad            # 16 -> sublane multiple
    N_flat = 2 * tk                     # 2 reduction steps exercise the accumulator

    key = jax.random.PRNGKey(0)
    k_x, k_w, k_b = jax.random.split(key, 3)

    tokens_flat = [t for toks in sentences for t in toks]
    n_tok = len(tokens_flat)

    # TODO(synk): synthetic stand-in for the (detached) XLM transformer BPE embeddings.
    x = jnp.zeros((N_flat, bpe_dim), jnp.float32)
    x = x.at[:n_tok].set(jax.random.normal(k_x, (n_tok, bpe_dim), jnp.float32))

    # Deterministic Linear(bpe_dim -> word_dim) parameters.
    W = jax.random.normal(k_w, (word_dim, bpe_dim), jnp.float32) * 0.05
    b = jax.random.normal(k_b, (word_dim,), jnp.float32) * 0.05

    seg_flat, n_words = build_segment_ids(sentences, n_words_pad, N_flat)

    out = jax.block_until_ready(
        averaging_bpe_lexer(x, W, b, seg_flat, n_rows=n_rows, tk=tk))

    ref = reference(x, W, b, seg_flat, n_rows)
    assert out.shape == (n_rows, word_dim)
    # Intentionally bf16-class tolerance: inputs, weight and the per-token h are
    # bf16-rounded (accumulation in f32), matching the reference's roundings.
    err = float(jnp.max(jnp.abs(out - ref)))
    assert jnp.allclose(out, ref, atol=2e-2, rtol=2e-2), err

    # Per-sentence word embeddings (the PyTorch forward output):
    words = out.reshape(B, n_words_pad, word_dim)
    # words[b, :n_words[b]]  ==  AveragingBPELexer.forward(sentence b)

    print("KERNEL_OK")
</pallas_src>

<mosaic_0001>
module attributes {stable_mosaic.version = 11 : i64} {
  func.func @lexer_kernel(%arg0: i32, %arg1: memref<512x256xbf16, #tpu.memory_space<vmem>>, %arg2: memref<256x256xbf16, #tpu.memory_space<vmem>>, %arg3: memref<1x256xf32, #tpu.memory_space<vmem>>, %arg4: memref<1x512xi32, #tpu.memory_space<vmem>>, %arg5: memref<16x256xf32, #tpu.memory_space<vmem>>, %arg6: memref<16x256xf32, #tpu.memory_space<vmem>>) attributes {dimension_semantics = [#tpu.dimension_semantics<arbitrary>], iteration_bounds = array<i64: 2>, scalar_prefetch = 0 : i64, scratch_operands = 1 : i64, tpu.core_type = #tpu.core_type<tc>, window_params = [{transform_indices = @transform_0, window_bounds = array<i64: 512, 256>}, {pipeline_mode = #tpu.pipeline_mode<synchronous>, transform_indices = @transform_1, window_bounds = array<i64: 256, 256>}, {pipeline_mode = #tpu.pipeline_mode<synchronous>, transform_indices = @transform_2, window_bounds = array<i64: 1, 256>}, {transform_indices = @transform_3, window_bounds = array<i64: 1, 512>}, {pipeline_mode = #tpu.pipeline_mode<synchronous>, transform_indices = @transform_4, window_bounds = array<i64: 16, 256>}]} {
    %c0_i32 = arith.constant 0 : i32
    %0 = arith.cmpi eq, %arg0, %c0_i32 : i32
    %1 = arith.extui %0 : i1 to i32
    %c0_i32_0 = arith.constant 0 : i32
    %2 = arith.cmpi ne, %1, %c0_i32_0 : i32
    scf.if %2 {
      %cst_14 = arith.constant 0.000000e+00 : f32
      %25 = vector.broadcast %cst_14 : f32 to vector<16x256xf32>
      %c0_15 = arith.constant 0 : index
      %c0_16 = arith.constant 0 : index
      %26 = vector.load %arg6[%c0_15, %c0_16] : memref<16x256xf32, #tpu.memory_space<vmem>>, vector<16x256xf32>
      tpu.vector_store %arg6[%c0_15, %c0_16], %25 {strides = array<i32>} : memref<16x256xf32, #tpu.memory_space<vmem>>, vector<16x256xf32>,
    } else {
    }
    %c0 = arith.constant 0 : index
    %c0_1 = arith.constant 0 : index
    %3 = vector.load %arg1[%c0, %c0_1] : memref<512x256xbf16, #tpu.memory_space<vmem>>, vector<512x256xbf16>
    %c0_2 = arith.constant 0 : index
    %c0_3 = arith.constant 0 : index
    %4 = vector.load %arg2[%c0_2, %c0_3] : memref<256x256xbf16, #tpu.memory_space<vmem>>, vector<256x256xbf16>
    %cst = arith.constant dense<0.000000e+00> : vector<512x256xf32>
    %5 = tpu.matmul %3, %4, %cst {dimension_numbers = #tpu.dot_dimension_numbers<[1], [1], [0], [0], [0, 0, 1, 0], [], []>} : vector<512x256xbf16>, vector<256x256xbf16>, vector<512x256xf32> -> vector<512x256xf32>
    %c0_4 = arith.constant 0 : index
    %c0_5 = arith.constant 0 : index
    %6 = vector.load %arg3[%c0_4, %c0_5] : memref<1x256xf32, #tpu.memory_space<vmem>>, vector<1x256xf32>
    %7 = vector.broadcast %6 : vector<1x256xf32> to vector<512x256xf32>
    %8 = arith.addf %5, %7 : vector<512x256xf32>
    %9 = math.tanh %8 : vector<512x256xf32>
    %c0_6 = arith.constant 0 : index
    %c0_7 = arith.constant 0 : index
    %10 = vector.load %arg4[%c0_6, %c0_7] : memref<1x512xi32, #tpu.memory_space<vmem>>, vector<1x512xi32>
    %11 = tpu.iota {dimensions = array<i32: 0>} : vector<16x512xi32>
    %12 = vector.broadcast %10 : vector<1x512xi32> to vector<16x512xi32>
    %13 = arith.cmpi eq, %11, %12 : vector<16x512xi32>
    %14 = arith.extui %13 : vector<16x512xi1> to vector<16x512xi32>
    %15 = arith.sitofp %14 : vector<16x512xi32> to vector<16x512xf32>
    %16 = arith.truncf %15 : vector<16x512xf32> to vector<16x512xbf16>
    %c0_8 = arith.constant 0 : index
    %c0_9 = arith.constant 0 : index
    %17 = vector.load %arg6[%c0_8, %c0_9] : memref<16x256xf32, #tpu.memory_space<vmem>>, vector<16x256xf32>
    %18 = arith.truncf %9 : vector<512x256xf32> to vector<512x256xbf16>
    %cst_10 = arith.constant dense<0.000000e+00> : vector<16x256xf32>
    %19 = tpu.matmul %16, %18, %cst_10 {dimension_numbers = #tpu.dot_dimension_numbers<[1], [0], [0], [1], [0, 0, 1, 1], [], []>} : vector<16x512xbf16>, vector<512x256xbf16>, vector<16x256xf32> -> vector<16x256xf32>
    %20 = arith.addf %17, %19 : vector<16x256xf32>
    %c0_11 = arith.constant 0 : index
    %c0_12 = arith.constant 0 : index
    %21 = vector.load %arg6[%c0_11, %c0_12] : memref<16x256xf32, #tpu.memory_space<vmem>>, vector<16x256xf32>
    tpu.vector_store %arg6[%c0_11, %c0_12], %20 {strides = array<i32>} : memref<16x256xf32, #tpu.memory_space<vmem>>, vector<16x256xf32>,
    %c1_i32 = arith.constant 1 : i32
    %22 = arith.cmpi eq, %arg0, %c1_i32 : i32
    %23 = arith.extui %22 : i1 to i32
    %c0_i32_13 = arith.constant 0 : i32
    %24 = arith.cmpi ne, %23, %c0_i32_13 : i32
    scf.if %24 {
      %c0_14 = arith.constant 0 : index
      %c0_15 = arith.constant 0 : index
      %25 = vector.load %arg6[%c0_14, %c0_15] : memref<16x256xf32, #tpu.memory_space<vmem>>, vector<16x256xf32>
      %c0_16 = arith.constant 0 : index
      %c0_17 = arith.constant 0 : index
      %26 = vector.load %arg5[%c0_16, %c0_17] : memref<16x256xf32, #tpu.memory_space<vmem>>, vector<16x256xf32>
      tpu.vector_store %arg5[%c0_16, %c0_17], %25 {strides = array<i32>} : memref<16x256xf32, #tpu.memory_space<vmem>>, vector<16x256xf32>,
    } else {
    }
    return
  }
  func.func @transform_0(%arg0: i32) -> (i32, i32) {
    %c0_i32 = arith.constant 0 : i32
    %c0_i32_0 = arith.constant 0 : i32
    return %arg0, %c0_i32 : i32, i32
  }
  func.func @transform_1(%arg0: i32) -> (i32, i32) {
    %c0_i32 = arith.constant 0 : i32
    %c0_i32_0 = arith.constant 0 : i32
    %c0_i32_1 = arith.constant 0 : i32
    return %c0_i32, %c0_i32_0 : i32, i32
  }
  func.func @transform_2(%arg0: i32) -> (i32, i32) {
    %c0_i32 = arith.constant 0 : i32
    %c0_i32_0 = arith.constant 0 : i32
    %c0_i32_1 = arith.constant 0 : i32
    return %c0_i32, %c0_i32_0 : i32, i32
  }
  func.func @transform_3(%arg0: i32) -> (i32, i32) {
    %c0_i32 = arith.constant 0 : i32
    %c0_i32_0 = arith.constant 0 : i32
    return %c0_i32, %arg0 : i32, i32
  }
  func.func @transform_4(%arg0: i32) -> (i32, i32) {
    %c0_i32 = arith.constant 0 : i32
    %c0_i32_0 = arith.constant 0 : i32
    %c0_i32_1 = arith.constant 0 : i32
    return %c0_i32, %c0_i32_0 : i32, i32
  }
}

</mosaic_0001>

<bundles_post_ra>
// kernel: tpu_custom_call.1
= control target key start
LH: loop header
LB: loop body
LE: loop exit
PB: predicated region body
PF: predicated region fallthrough
CT: control target
= control target key end

     0   :  { %9 = vsyncpa [#allocation4], 0  ;;  %s3235_s0 = inlined_call_operand.hbm [shape: bf16[1024,256], index: 0, kind: input, shape index: {}]   ;;  %s3236_s1 = inlined_call_operand.hbm [shape: bf16[256,256], index: 1, kind: input, shape index: {}]   ;;  %s3237_s2 = inlined_call_operand.vmem [shape: f32[1,256], index: 2, kind: input, shape index: {}]   ;;  %s3238_s3 = inlined_call_operand.hbm [shape: s32[1,1024], index: 3, kind: input, shape index: {}]   ;;  %s3239_s4 = inlined_call_operand.hbm [shape: f32[16,256], index: 4, kind: output, shape index: {}]  }
   0x1   :  { %11 = vsyncpa [#allocation4 + $0x1], 0 }
   0x2   :  { %12 = vsyncpa [#allocation7], 0 }
   0x3   :  { %13 = vsyncpa [#allocation5], 0  ;;  %s2471_s15 = smov 0   ;;  %s2473_s16 = smov 0  }
   0x4   :  { %s2475_s17 = smov 0   ;;  %s2477_s18 = smov 0  }
   0x5 LB: > { %s2492_s19 = sadd.s32 1, %s2434_s18   ;;  %s26_s20 = sadd.s32 1, %s2430_s17  ;;  %s2434_s18 = sphi %s2477_s18, %s3315_s18   ;;  %s2430_s17 = sphi %s2475_s17, %s3314_s17   ;;  %s2426_s16 = sphi %s2473_s16, %s3313_s16   ;;  %s2422_s15 = sphi %s2471_s15, %s3312_s15  }
   0x6   : > { %s23_s21 = ssub.s32 %s2434_s18, %s2492_s19  ;;  %p33_p0 = scmp.ne.s32.totalorder %s2430_s17, %s2426_s16 }
   0x7   : > { %p24_p1 = scmp.eq.s32.totalorder %s23_s21, 0  ;;  %p34_p2 = scmp.eq.s32.totalorder %s2434_s18, 0 }
   0x8   : > { %p1837_p4 = scmp.lt.s32.totalorder %s2434_s18, 2  ;;  %s168_s23 = sand.u32 1, %s2434_s18  }
   0x9   : > { %s2501_s22 = scalar_select %p24_p1, %s2430_s17, %s26_s20  }
   0xa   : > { %p35_p3 = por %p34_p2, %p33_p0  ;;  %s170_s24 = sand.u32 1, %s2430_s17  }
   0xb   : > { %s1649_s25 = sshll.u32 %s170_s24, 9  ;;  %s1779_s26 = sshll.u32 %s2434_s18, 13 }
   0xc   : > { %s2512_s29 = scalar_lea.hbm %s3235_s0, %s1779_s26  ;;  %s172_s30 = scalar_lea.vmem [#allocation3], %s1649_s25 }
   0xd   : > { %s180_s5 = sshll.u32 %s172_s30, 4  ;;  %p2514_p5 = pnand %p1837_p4, %p35_p3  ;;  %s2518_s5 = int_to_ptr.vmem [resolvable:$true] %s180_s5 }
   0xe   : > { %s2520_s7 = scalar_lea.sflag [#allocation4], %s168_s23  ;;  %s2282_s8 = scalar_lea.hbm %s2512_s29, 8192 }
   0xf   : > { %p2283_p6 = scmp.ne.s32.totalorder %s2512_s29, %s2282_s8  ;;  %p3240_p7 = pneg %p2514_p5 }
  0x10   : > { %s2287_s11 = scalar_lea.hbm %s3235_s0, 16384  ;;  %p2288_p10 = scmp.lt.s32.totalorder %s2512_s29, %s3235_s0 }
  0x11   : > { %p2285_p8 = pnand %p3240_p7, %p2283_p6  ;;  %p2289_p11 = scmp.lt.s32.totalorder %s2287_s11, %s2282_s8 }
  0x13   : > { %p2286_p9 = pneg %p2285_p8  ;;  %p2290_p12 = por %p2289_p11, %p2288_p10 }
  0x15   : > { %p2291_p13 = pnand %p2290_p12, %p2286_p9 }
  0x17   : > { %2294 = shalt.err (!%p2291_p13)
}
  0x18   : > { %s2295_s14 = scalar_lea.vmem %s2518_s5, 8192  ;;  %s2436_s20 = smov [#allocation3]  }
  0x19   : > { %p2296_p0 = scmp.ne.s32.totalorder %s2518_s5, %s2295_s14  ;;  %s2300_s21 = sshll.u32 %s2436_s20, 4  ;;  %s2301_s21 = int_to_ptr.vmem [resolvable:$false] %s2300_s21 }
  0x1a   : > { %s2302_s23 = scalar_lea.vmem %s2301_s21, 16384  ;;  %p2303_p3 = scmp.lt.s32.totalorder %s2518_s5, %s2301_s21 }
  0x1b   : > { %p2298_p1 = pnand %p2296_p0, %p3240_p7  ;;  %p2304_p4 = scmp.lt.s32.totalorder %s2302_s23, %s2295_s14 }
  0x1d   : > { %p2299_p2 = pneg %p2298_p1  ;;  %p2305_p6 = por %p2304_p4, %p2303_p3 }
  0x1f   : > { %p2306_p8 = pnand %p2305_p6, %p2299_p2 }
  0x21   : > { %2309 = shalt.err (!%p2306_p8)
}
  0x22   : > { %s2437_s25 = smov 128   ;;  %s2438_s26 = smov 8  }
  0x23   : > { %1832 = dma.hbm_to_vmem [thread:$0]  (!%p2514_p5), %s2512_s29, 8192, %s2518_s5, %s2520_s7, %s2437_s25, %s2437_s25, %s2438_s26  }
  0x24   : > { %s2551_s27 = sadd.s32 4294967295, %s2434_s18   ;;  %p39_p9 = scmp.ne.s32.totalorder %s2426_s16, %s2422_s15 }
  0x25   : > { %p3241_p10 = scmp.eq.s32.totalorder %s2551_s27, 0  ;;  %p1646_p11 = scmp.ge.s32.totalorder %s2434_s18, 1 }
  0x26   : > { %p139_p12 = scmp.lt.s32.totalorder %s2434_s18, 3  ;;  %s2439_s29 = smov [#allocation6]  }
  0x27   : > { %p2561_p0 = por %p3241_p10, %p39_p9  ;;  %s151_s5 = sshll.u32 %s2439_s29, 4  ;;  %s152_s5 = int_to_ptr.vmem [resolvable:$true] %s151_s5 }
  0x28   : > { %p2565_p1 = pnand %p1646_p11, %p139_p12  ;;  %s1653_s8 = sshll.u32 %s170_s24, 2 }
  0x29   : > { %s3257_s28 = scalar_select %p2561_p0, 1, 0 }
  0x2a   : > { %p1825_p2 = pneg %p2565_p1  ;;  %s1780_s15 = sshll.u32 %s2434_s18, 6 }
  0x2b   : > { %s194_s9 = scalar_lea.vmem [#allocation8], %s1653_s8  ;;  %s2579_s13 = scalar_lea.hbm %s3238_s3, %s1780_s15 }
  0x2c   : > { %s202_s10 = sshll.u32 %s194_s9, 4  ;;  %p1826_p3 = pnand %p1825_p2, %p3241_p10  ;;  %s2581_s10 = int_to_ptr.vmem [resolvable:$true] %s202_s10 }
  0x2d   : > { %s2321_s14 = scalar_lea.vmem %s152_s5, 4096  ;;  %p2329_p11 = scmp.lt.s32.totalorder %s152_s5, %s152_s5 }
  0x2e   : > { %p2312_p4 = pneg %p1826_p3  ;;  %p2322_p6 = scmp.ne.s32.totalorder %s152_s5, %s2321_s14 }
  0x2f   : > { %p2330_p12 = scmp.lt.s32.totalorder %s2321_s14, %s2321_s14 }
  0x30   : > { %p2324_p8 = pnand %p2322_p6, %p2312_p4 }
  0x31   : > { %p2331_p13 = por %p2330_p12, %p2329_p11 }
  0x32   : > { %p2325_p9 = pneg %p2324_p8 }
  0x34   : > { %p2332_p7 = pnand %p2331_p13, %p2325_p9 }
  0x36   : > { %2335 = shalt.err (!%p2332_p7)
}
  0x37   : > { %1828 = dma.hbm_to_vmem [thread:$0]  (!%p1826_p3), %s3236_s1, 4096, %s152_s5, [#allocation7], %s2437_s25, %s2437_s25, %s2438_s26  }
  0x38   : > { %s2336_s20 = scalar_lea.hbm %s2579_s13, 64  ;;  %p3259_p4 = pneg %p2514_p5 }
  0x39   : > { %p2337_p2 = scmp.ne.s32.totalorder %s2579_s13, %s2336_s20  ;;  %s2341_s29 = scalar_lea.hbm %s3238_s3, 128 }
  0x3a   : > { %p2342_p7 = scmp.lt.s32.totalorder %s2579_s13, %s3238_s3  ;;  %p2343_p13 = scmp.lt.s32.totalorder %s2341_s29, %s2336_s20 }
  0x3b   : > { %p2339_p6 = pnand %p2337_p2, %p3259_p4 }
  0x3c   : > { %p2344_p9 = por %p2343_p13, %p2342_p7 }
  0x3d   : > { %p2340_p8 = pneg %p2339_p6 }
  0x3f   : > { %p2345_p11 = pnand %p2344_p9, %p2340_p8 }
  0x41   : > { %2348 = shalt.err (!%p2345_p11)
}
  0x42   : > { %s2349_s25 = scalar_lea.vmem %s2581_s10, 64  ;;  %p3260_p12 = pmov %p3259_p4 }
  0x43   : > { %p2350_p3 = scmp.ne.s32.totalorder %s2581_s10, %s2349_s25  ;;  %s2440_s26 = smov [#allocation8]  }
  0x44   : > { %s2354_s5 = sshll.u32 %s2440_s26, 4  ;;  %s2355_s5 = int_to_ptr.vmem [resolvable:$false] %s2354_s5 }
  0x45   : > { %p2352_p2 = pnand %p2350_p3, %p3260_p12  ;;  %s2356_s9 = scalar_lea.vmem %s2355_s5, 128 }
  0x46   : > { %p2357_p6 = scmp.lt.s32.totalorder %s2581_s10, %s2355_s5  ;;  %p2358_p10 = scmp.lt.s32.totalorder %s2356_s9, %s2349_s25 }
  0x47   : > { %p2353_p4 = pneg %p2352_p2 }
  0x48   : > { %p2359_p0 = por %p2358_p10, %p2357_p6 }
  0x4a   : > { %p2360_p7 = pnand %p2359_p0, %p2353_p4 }
  0x4c   : > { %2363 = shalt.err (!%p2360_p7)
}
  0x4d   : > { %1835 = dma.hbm_to_vmem [thread:$0]  (!%p2514_p5), %s2579_s13, 64, %s2581_s10, %s2520_s7  }
  0x4e   : > { %211 = sbr.rel (%p2565_p1) target bundleno = 894 (0x37e), region = 36 }
  0x53   : > { %s213_s11 = sand.u32 1, %s2551_s27   ;;  %s215_s12 = sand.u32 1, %s2426_s16  }
  0x54   : > { %s1657_s14 = sshll.u32 %s215_s12, 9  ;;  %s214_s18 = scalar_lea.sflag [#allocation4], %s213_s11 }
  0x55   : > { %s2616_s24 = scalar_lea.vmem [#allocation3], %s1657_s14  ;;  %p3261_p10 = scmp.ne.s32.totalorder %s3257_s28, 0 }
  0x57   : > { %2405 = dma.done.wait (%p3261_p10), %s214_s18, 8192  }
  0x58   : > { %2407 = vsyncadd (%p3261_p10), %s214_s18, 4294959104  ;;  %p3262_p0 = scmp.eq.s32.totalorder %s2551_s27, 0 }
  0x5a   : > { %2409 = dma.done.wait (%p3262_p0), [#allocation7], 4096   ;;  %p3263_p5 = pmov %p3262_p0 }
  0x5b   : > { %s2626_s6 = sshll.u32 %s215_s12, 2 }
  0x5c   : > { %2411 = vsyncadd (%p3263_p5), [#allocation7], 4294963200  ;;  %s230_s7 = scalar_lea.vmem [#allocation8], %s2626_s6 }
  0x5d   : > { %2413 = dma.done.wait (%p3261_p10), %s214_s18, 64  }
  0x5e   : > { %2415 = vsyncadd (%p3261_p10), %s214_s18, 4294967232  ;;  %p3264_p1 = scmp.ne.s32.totalorder %s2551_s27, 0 }
  0x60   : > { %260 = sbr.rel (%p3264_p1) target bundleno = 104 (0x68), region = 52 }
  0x65   : > { %v2441_v0 = vmov 0.0  }
  0x66   : > { %261 = vst [vmem:[#allocation2 + $0x10] sm:$0xff] %v2441_v0  ;;  %262 = vst [vmem:[#allocation2] sm:$0xff] %v2441_v0 }
  0x67   : > { %263 = vst [vmem:[#allocation2 + $0x18] sm:$0xff] %v2441_v0  ;;  %264 = vst [vmem:[#allocation2 + $0x8] sm:$0xff] %v2441_v0 }
  0x68 PF: > { %v1881_v1 = vld [vmem:[#allocation6 + $0x74] ss:$8 sps:$4 sm:$0xff]   ;;  %v1883_v2 = vld [vmem:[#allocation6 + $0x70] ss:$8 sps:$4 sm:$0xff]   ;;  %v1884_v3 = vld [vmem:[#allocation6 + $0x64] ss:$8 sps:$4 sm:$0xff]  }
  0x69   : > { %853 = vmatprep.subr.bf16.mxu0 %v1881_v1  ;;  %1781 = vmatprep.subr.bf16.mxu1 %v1881_v1  ;;  %v1886_v4 = vld [vmem:[#allocation6 + $0x60] ss:$8 sps:$4 sm:$0xff]   ;;  %v1887_v5 = vld [vmem:[#allocation6 + $0x54] ss:$8 sps:$4 sm:$0xff]   ;;  %v1889_v6 = vld [vmem:[#allocation6 + $0x50] ss:$8 sps:$4 sm:$0xff]  }
  0x6a   : > { %854 = vmatpush1.bf16.xpose.msra.mxu0 %v1883_v2  ;;  %1797 = vmatpush1.bf16.xpose.msra.mxu1 %v1883_v2  ;;  %v1890_v7 = vld [vmem:[#allocation6 + $0x44] ss:$8 sps:$4 sm:$0xff]   ;;  %v1892_v9 = vld [vmem:[#allocation6 + $0x40] ss:$8 sps:$4 sm:$0xff]   ;;  %v1893_v10 = vld [vmem:[#allocation6 + $0x34] ss:$8 sps:$4 sm:$0xff]  }
  0x6b   : > { %855 = vmatprep.subr.bf16.mxu0 %v1884_v3  ;;  %1782 = vmatprep.subr.bf16.mxu1 %v1884_v3  ;;  %v1931_v8 = vld [vmem:[%s2616_s24 + $0x4] ss:$8 sps:$4 sm:$0xff]   ;;  %v1895_v11 = vld [vmem:[#allocation6 + $0x30] ss:$8 sps:$4 sm:$0xff]   ;;  %v1898_v13 = vld [vmem:[#allocation6 + $0x20] ss:$8 sps:$4 sm:$0xff]  }
  0x6c   : > { %885 = vmatprep.mubr.bf16.mxu0 %v1931_v8  ;;  %v1896_v12 = vld [vmem:[#allocation6 + $0x24] ss:$8 sps:$4 sm:$0xff]   ;;  %v1899_v14 = vld [vmem:[#allocation6 + $0x14] ss:$8 sps:$4 sm:$0xff]   ;;  %v1901_v15 = vld [vmem:[#allocation6 + $0x10] ss:$8 sps:$4 sm:$0xff]  }
  0x6d   : > { %v1902_v16 = vld [vmem:[#allocation6 + $0x4] ss:$8 sps:$4 sm:$0xff]   ;;  %v1904_v17 = vld [vmem:[#allocation6] ss:$8 sps:$4 sm:$0xff]   ;;  %v1905_v18 = vld [vmem:[#allocation6 + $0xf4] ss:$8 sps:$4 sm:$0xff]  }
  0x6e   : > { %v1907_v19 = vld [vmem:[#allocation6 + $0xf0] ss:$8 sps:$4 sm:$0xff]   ;;  %v1908_v20 = vld [vmem:[#allocation6 + $0xe4] ss:$8 sps:$4 sm:$0xff]   ;;  %v1910_v21 = vld [vmem:[#allocation6 + $0xe0] ss:$8 sps:$4 sm:$0xff]  }
  0x6f   : > { %v1911_v22 = vld [vmem:[#allocation6 + $0xd4] ss:$8 sps:$4 sm:$0xff]   ;;  %v1913_v23 = vld [vmem:[#allocation6 + $0xd0] ss:$8 sps:$4 sm:$0xff]   ;;  %v1914_v24 = vld [vmem:[#allocation6 + $0xc4] ss:$8 sps:$4 sm:$0xff]  }
  0x70   : > { %v1916_v25 = vld [vmem:[#allocation6 + $0xc0] ss:$8 sps:$4 sm:$0xff]   ;;  %v1917_v26 = vld [vmem:[#allocation6 + $0xb4] ss:$8 sps:$4 sm:$0xff]   ;;  %v1919_v27 = vld [vmem:[#allocation6 + $0xb0] ss:$8 sps:$4 sm:$0xff]  }
  0x71   : > { %v1920_v28 = vld [vmem:[#allocation6 + $0xa4] ss:$8 sps:$4 sm:$0xff]   ;;  %v1972_v29 = vld [vmem:[%s2616_s24 + $0x154] ss:$8 sps:$4 sm:$0xff]   ;;  %v1922_v30 = vld [vmem:[#allocation6 + $0xa0] ss:$8 sps:$4 sm:$0xff]  }
  0x72   : > { %856 = vmatpush1.bf16.xpose.msra.mxu0 %v1886_v4  ;;  %1798 = vmatpush1.bf16.xpose.msra.mxu1 %v1886_v4  ;;  %v1923_v31 = vld [vmem:[#allocation6 + $0x94] ss:$8 sps:$4 sm:$0xff]   ;;  %v1925_v32 = vld [vmem:[#allocation6 + $0x90] ss:$8 sps:$4 sm:$0xff]   ;;  %v1926_v33 = vld [vmem:[#allocation6 + $0x84] ss:$8 sps:$4 sm:$0xff]  }
  0x73   : > { %857 = vmatprep.subr.bf16.mxu0 %v1887_v5  ;;  %1783 = vmatprep.subr.bf16.mxu1 %v1887_v5  ;;  %v1928_v34 = vld [vmem:[#allocation6 + $0x80] ss:$8 sps:$4 sm:$0xff]   ;;  %v1970_v36 = vld [vmem:[%s2616_s24 + $0x150] ss:$8 sps:$4 sm:$0xff]   ;;  %v1932_v37 = vld [vmem:[%s2616_s24 + $0x14] ss:$8 sps:$4 sm:$0xff]  }
  0x74   : > { %1095 = vmatprep.mubr.bf16.mxu1 %v1972_v29  ;;  %v1929_v35 = vld [vmem:[%s2616_s24] ss:$8 sps:$4 sm:$0xff]   ;;  %v1976_v38 = vld [vmem:[%s2616_s24 + $0x164] ss:$8 sps:$4 sm:$0xff]   ;;  %v1934_v39 = vld [vmem:[%s2616_s24 + $0x10] ss:$8 sps:$4 sm:$0xff]  }
  0x75   : > { %v1979_v40 = vld [vmem:[%s2616_s24 + $0x160] ss:$8 sps:$4 sm:$0xff]   ;;  %v1935_v41 = vld [vmem:[%s2616_s24 + $0x24] ss:$8 sps:$4 sm:$0xff]   ;;  %v1982_v42 = vld [vmem:[%s2616_s24 + $0x174] ss:$8 sps:$4 sm:$0xff]  }
  0x76   : > { %v1937_v43 = vld [vmem:[%s2616_s24 + $0x20] ss:$8 sps:$4 sm:$0xff]   ;;  %v1985_v44 = vld [vmem:[%s2616_s24 + $0x170] ss:$8 sps:$4 sm:$0xff]   ;;  %v1938_v45 = vld [vmem:[%s2616_s24 + $0x34] ss:$8 sps:$4 sm:$0xff]  }
  0x77   : > { %v1986_v46 = vld [vmem:[%s2616_s24 + $0x184] ss:$8 sps:$4 sm:$0xff]   ;;  %v1940_v47 = vld [vmem:[%s2616_s24 + $0x30] ss:$8 sps:$4 sm:$0xff]   ;;  %v1988_v48 = vld [vmem:[%s2616_s24 + $0x180] ss:$8 sps:$4 sm:$0xff]  }
  0x78   : > { %v1941_v49 = vld [vmem:[%s2616_s24 + $0x44] ss:$8 sps:$4 sm:$0xff]   ;;  %v1992_v50 = vld [vmem:[%s2616_s24 + $0x194] ss:$8 sps:$4 sm:$0xff]   ;;  %v1943_v51 = vld [vmem:[%s2616_s24 + $0x40] ss:$8 sps:$4 sm:$0xff]  }
  0x79   : > { %v1994_v52 = vld [vmem:[%s2616_s24 + $0x190] ss:$8 sps:$4 sm:$0xff]   ;;  %v1944_v53 = vld [vmem:[%s2616_s24 + $0x54] ss:$8 sps:$4 sm:$0xff]   ;;  %v1998_v54 = vld [vmem:[%s2616_s24 + $0x1a4] ss:$8 sps:$4 sm:$0xff]  }
  0x7a   : > { %858 = vmatpush1.bf16.xpose.msra.mxu0 %v1889_v6  ;;  %1799 = vmatpush1.bf16.xpose.msra.mxu1 %v1889_v6  ;;  %v1946_v55 = vld [vmem:[%s2616_s24 + $0x50] ss:$8 sps:$4 sm:$0xff]   ;;  %v2000_v56 = vld [vmem:[%s2616_s24 + $0x1a0] ss:$8 sps:$4 sm:$0xff]   ;;  %v1947_v57 = vld [vmem:[%s2616_s24 + $0x64] ss:$8 sps:$4 sm:$0xff]  }
  0x7b   : > { %859 = vmatprep.subr.bf16.mxu0 %v1890_v7  ;;  %1784 = vmatprep.subr.bf16.mxu1 %v1890_v7  ;;  %v2004_v58 = vld [vmem:[%s2616_s24 + $0x1b4] ss:$8 sps:$4 sm:$0xff]   ;;  %v1949_v59 = vld [vmem:[%s2616_s24 + $0x60] ss:$8 sps:$4 sm:$0xff]   ;;  %v2006_v60 = vld [vmem:[%s2616_s24 + $0x1b0] ss:$8 sps:$4 sm:$0xff]  }
  0x7c   : > { %v1950_v61 = vld [vmem:[%s2616_s24 + $0x74] ss:$8 sps:$4 sm:$0xff]   ;;  %v2010_v62 = vld [vmem:[%s2616_s24 + $0x1c4] ss:$8 sps:$4 sm:$0xff]   ;;  %v1952_v63 = vld [vmem:[%s2616_s24 + $0x70] ss:$8 sps:$4 sm:$0xff]  }
  0x7d   : > { %v2012_v0 = vld [vmem:[%s2616_s24 + $0x1c0] ss:$8 sps:$4 sm:$0xff]   ;;  %v1953_v1 = vld [vmem:[%s2616_s24 + $0x84] ss:$8 sps:$4 sm:$0xff]   ;;  %v2016_v2 = vld [vmem:[%s2616_s24 + $0x1d4] ss:$8 sps:$4 sm:$0xff]  }
  0x7e   : > { %v1955_v3 = vld [vmem:[%s2616_s24 + $0x80] ss:$8 sps:$4 sm:$0xff]   ;;  %v2018_v4 = vld [vmem:[%s2616_s24 + $0x1d0] ss:$8 sps:$4 sm:$0xff]   ;;  %v1956_v5 = vld [vmem:[%s2616_s24 + $0x94] ss:$8 sps:$4 sm:$0xff]  }
  0x7f   : > { %v2019_v6 = vld [vmem:[%s2616_s24 + $0x1e4] ss:$8 sps:$4 sm:$0xff]   ;;  %v1958_v7 = vld [vmem:[%s2616_s24 + $0x90] ss:$8 sps:$4 sm:$0xff]   ;;  %v2021_v8 = vld [vmem:[%s2616_s24 + $0x1e0] ss:$8 sps:$4 sm:$0xff]  }
  0x80   : > { %v2007_v29 = vld [vmem:[%s2616_s24 + $0x134] ss:$8 sps:$4 sm:$0xff]   ;;  %p1773_p8 = scmp.ne.s32.totalorder %s2551_s27, 1 }
  0x82   : > { %860 = vmatpush1.bf16.xpose.msra.mxu0 %v1892_v9  ;;  %1800 = vmatpush1.bf16.xpose.msra.mxu1 %v1892_v9  ;;  %v1959_v9 = vld [vmem:[%s2616_s24 + $0xa4] ss:$8 sps:$4 sm:$0xff]  }
  0x83   : > { %861 = vmatprep.subr.bf16.mxu0 %v1893_v10  ;;  %1785 = vmatprep.subr.bf16.mxu1 %v1893_v10  ;;  %v2022_v10 = vld [vmem:[%s2616_s24 + $0x1f4] ss:$8 sps:$4 sm:$0xff]  }
  0x8a   : > { %862 = vmatpush1.bf16.xpose.msra.mxu0 %v1895_v11  ;;  %1801 = vmatpush1.bf16.xpose.msra.mxu1 %v1895_v11  ;;  %v1961_v11 = vld [vmem:[%s2616_s24 + $0xa0] ss:$8 sps:$4 sm:$0xff]  }
  0x8b   : > { %863 = vmatprep.subr.bf16.mxu0 %v1896_v12  ;;  %1786 = vmatprep.subr.bf16.mxu1 %v1896_v12  ;;  %v2024_v12 = vld [vmem:[%s2616_s24 + $0x1f0] ss:$8 sps:$4 sm:$0xff]  }
  0x92   : > { %864 = vmatpush1.bf16.xpose.msra.mxu0 %v1898_v13  ;;  %1802 = vmatpush1.bf16.xpose.msra.mxu1 %v1898_v13  ;;  %v1962_v13 = vld [vmem:[%s2616_s24 + $0xb4] ss:$8 sps:$4 sm:$0xff]  }
  0x93   : > { %865 = vmatprep.subr.bf16.mxu0 %v1899_v14  ;;  %1787 = vmatprep.subr.bf16.mxu1 %v1899_v14  ;;  %v1964_v14 = vld [vmem:[%s2616_s24 + $0xb0] ss:$8 sps:$4 sm:$0xff]  }
  0x9a   : > { %866 = vmatpush1.bf16.xpose.msra.mxu0 %v1901_v15  ;;  %1803 = vmatpush1.bf16.xpose.msra.mxu1 %v1901_v15  ;;  %v1965_v15 = vld [vmem:[%s2616_s24 + $0xc4] ss:$8 sps:$4 sm:$0xff]  }
  0x9b   : > { %867 = vmatprep.subr.bf16.mxu0 %v1902_v16  ;;  %1788 = vmatprep.subr.bf16.mxu1 %v1902_v16  ;;  %v1967_v16 = vld [vmem:[%s2616_s24 + $0xc0] ss:$8 sps:$4 sm:$0xff]  }
  0xa2   : > { %868 = vmatpush1.bf16.xpose.msra.mxu0 %v1904_v17  ;;  %1804 = vmatpush1.bf16.xpose.msra.mxu1 %v1904_v17  ;;  %v1968_v17 = vld [vmem:[%s2616_s24 + $0xd4] ss:$8 sps:$4 sm:$0xff]  }
  0xa3   : > { %869 = vmatprep.subr.bf16.mxu0 %v1905_v18  ;;  %1789 = vmatprep.subr.bf16.mxu1 %v1905_v18  ;;  %v1973_v18 = vld [vmem:[%s2616_s24 + $0xd0] ss:$8 sps:$4 sm:$0xff]  }
  0xaa   : > { %870 = vmatpush2.bf16.xpose.msra.mxu0 %v1907_v19  ;;  %1805 = vmatpush2.bf16.xpose.msra.mxu1 %v1907_v19  ;;  %v1974_v19 = vld [vmem:[%s2616_s24 + $0xe4] ss:$8 sps:$4 sm:$0xff]  }
  0xab   : > { %871 = vmatprep.subr.bf16.mxu0 %v1908_v20  ;;  %1790 = vmatprep.subr.bf16.mxu1 %v1908_v20  ;;  %v1978_v20 = vld [vmem:[%s2616_s24 + $0xe0] ss:$8 sps:$4 sm:$0xff]  }
  0xb2   : > { %872 = vmatpush2.bf16.xpose.msra.mxu0 %v1910_v21  ;;  %1806 = vmatpush2.bf16.xpose.msra.mxu1 %v1910_v21  ;;  %v1980_v21 = vld [vmem:[%s2616_s24 + $0xf4] ss:$8 sps:$4 sm:$0xff]  }
  0xb3   : > { %873 = vmatprep.subr.bf16.mxu0 %v1911_v22  ;;  %1791 = vmatprep.subr.bf16.mxu1 %v1911_v22  ;;  %v1984_v22 = vld [vmem:[%s2616_s24 + $0xf0] ss:$8 sps:$4 sm:$0xff]  }
  0xba   : > { %874 = vmatpush2.bf16.xpose.msra.mxu0 %v1913_v23  ;;  %1807 = vmatpush2.bf16.xpose.msra.mxu1 %v1913_v23  ;;  %v1989_v23 = vld [vmem:[%s2616_s24 + $0x104] ss:$8 sps:$4 sm:$0xff]  }
  0xbb   : > { %875 = vmatprep.subr.bf16.mxu0 %v1914_v24  ;;  %1792 = vmatprep.subr.bf16.mxu1 %v1914_v24  ;;  %v1991_v24 = vld [vmem:[%s2616_s24 + $0x100] ss:$8 sps:$4 sm:$0xff]  }
  0xc2   : > { %876 = vmatpush2.bf16.xpose.msra.mxu0 %v1916_v25  ;;  %1808 = vmatpush2.bf16.xpose.msra.mxu1 %v1916_v25  ;;  %v1995_v25 = vld [vmem:[%s2616_s24 + $0x114] ss:$8 sps:$4 sm:$0xff]  }
  0xc3   : > { %877 = vmatprep.subr.bf16.mxu0 %v1917_v26  ;;  %1793 = vmatprep.subr.bf16.mxu1 %v1917_v26  ;;  %v1997_v26 = vld [vmem:[%s2616_s24 + $0x110] ss:$8 sps:$4 sm:$0xff]  }
  0xca   : > { %878 = vmatpush2.bf16.xpose.msra.mxu0 %v1919_v27  ;;  %1809 = vmatpush2.bf16.xpose.msra.mxu1 %v1919_v27  ;;  %v2001_v27 = vld [vmem:[%s2616_s24 + $0x124] ss:$8 sps:$4 sm:$0xff]  }
  0xcb   : > { %879 = vmatprep.subr.bf16.mxu0 %v1920_v28  ;;  %1794 = vmatprep.subr.bf16.mxu1 %v1920_v28  ;;  %v2003_v28 = vld [vmem:[%s2616_s24 + $0x120] ss:$8 sps:$4 sm:$0xff]  }
  0xd2   : > { %880 = vmatpush2.bf16.xpose.msra.mxu0 %v1922_v30  ;;  %1810 = vmatpush2.bf16.xpose.msra.mxu1 %v1922_v30  ;;  %v2009_v30 = vld [vmem:[%s2616_s24 + $0x130] ss:$8 sps:$4 sm:$0xff]  }
  0xd3   : > { %881 = vmatprep.subr.bf16.mxu0 %v1923_v31  ;;  %1795 = vmatprep.subr.bf16.mxu1 %v1923_v31  ;;  %v2013_v31 = vld [vmem:[%s2616_s24 + $0x144] ss:$8 sps:$4 sm:$0xff]  }
  0xda   : > { %882 = vmatpush2.bf16.xpose.msra.mxu0 %v1925_v32  ;;  %1811 = vmatpush2.bf16.xpose.msra.mxu1 %v1925_v32  ;;  %v2015_v32 = vld [vmem:[%s2616_s24 + $0x140] ss:$8 sps:$4 sm:$0xff]  }
  0xdb   : > { %883 = vmatprep.subr.bf16.mxu0 %v1926_v33  ;;  %1796 = vmatprep.subr.bf16.mxu1 %v1926_v33  ;;  %v363_v33 = vlaneseq }
  0xe2   : > { %884 = vmatpush2.bf16.xpose.msra.mxu0 %v1928_v34  ;;  %1812 = vmatpush2.bf16.xpose.msra.mxu1 %v1928_v34  ;;  %v2699_v34 = vshrl.u32 %v363_v33, 7 }
  0xe9   : > { %886 = vmatmul.mubr.bf16.vlgmr.msra.gmra.mxu0 %v1929_v35  ;;  %1096 = vmatmul.mubr.bf16.vlgmr.msra.gmra.mxu1 %v1970_v36  ;;  %v3245_v35 = vsub.s32 0, %v2699_v34  ;;  %v361_v36 = vld [vmem:[%s3237_s2] sm:$0x3] }
  0xea   : > { %895 = vmatprep.mubr.bf16.mxu0 %v1932_v37  ;;  %1105 = vmatprep.mubr.bf16.mxu1 %v1976_v38  ;;  %v369_v37 = vsub.s32 1, %v2699_v34 }
  0xeb   : > { %v2708_v38 = vrot.slane %v361_v36, %v3245_v35 }
  0xf1   : > { %896 = vmatmul.mubr.bf16.gmra.mxu0 %v1934_v39  ;;  %1106 = vmatmul.mubr.bf16.gmra.mxu1 %v1979_v40  ;;  %v2712_v40 = vrot.slane %v361_v36, %v369_v37 }
  0xf2   : > { %905 = vmatprep.mubr.bf16.mxu0 %v1935_v41  ;;  %1115 = vmatprep.mubr.bf16.mxu1 %v1982_v42 }
  0xf9   : > { %906 = vmatmul.mubr.bf16.gmra.mxu0 %v1937_v43  ;;  %1116 = vmatmul.mubr.bf16.gmra.mxu1 %v1985_v44 }
  0xfa   : > { %915 = vmatprep.mubr.bf16.mxu0 %v1938_v45  ;;  %1125 = vmatprep.mubr.bf16.mxu1 %v1986_v46 }
 0x101   : > { %916 = vmatmul.mubr.bf16.gmra.mxu0 %v1940_v47  ;;  %1126 = vmatmul.mubr.bf16.gmra.mxu1 %v1988_v48 }
 0x102   : > { %925 = vmatprep.mubr.bf16.mxu0 %v1941_v49  ;;  %1135 = vmatprep.mubr.bf16.mxu1 %v1992_v50 }
 0x109   : > { %926 = vmatmul.mubr.bf16.gmra.mxu0 %v1943_v51  ;;  %1136 = vmatmul.mubr.bf16.gmra.mxu1 %v1994_v52 }
 0x10a   : > { %935 = vmatprep.mubr.bf16.mxu0 %v1944_v53  ;;  %1145 = vmatprep.mubr.bf16.mxu1 %v1998_v54 }
 0x111   : > { %936 = vmatmul.mubr.bf16.gmra.mxu0 %v1946_v55  ;;  %1146 = vmatmul.mubr.bf16.gmra.mxu1 %v2000_v56 }
 0x112   : > { %945 = vmatprep.mubr.bf16.mxu0 %v1947_v57  ;;  %1155 = vmatprep.mubr.bf16.mxu1 %v2004_v58 }
 0x119   : > { %946 = vmatmul.mubr.bf16.gmra.mxu0 %v1949_v59  ;;  %1156 = vmatmul.mubr.bf16.gmra.mxu1 %v2006_v60 }
 0x11a   : > { %955 = vmatprep.mubr.bf16.mxu0 %v1950_v61  ;;  %1165 = vmatprep.mubr.bf16.mxu1 %v2010_v62 }
 0x121   : > { %956 = vmatmul.mubr.bf16.gmra.mxu0 %v1952_v63  ;;  %1166 = vmatmul.mubr.bf16.gmra.mxu1 %v2012_v0 }
 0x122   : > { %965 = vmatprep.mubr.bf16.mxu0 %v1953_v1  ;;  %1175 = vmatprep.mubr.bf16.mxu1 %v2016_v2 }
 0x129   : > { %966 = vmatmul.mubr.bf16.gmra.mxu0 %v1955_v3  ;;  %1176 = vmatmul.mubr.bf16.gmra.mxu1 %v2018_v4 }
 0x12a   : > { %975 = vmatprep.mubr.bf16.mxu0 %v1956_v5  ;;  %1185 = vmatprep.mubr.bf16.mxu1 %v2019_v6 }
 0x131   : > { %976 = vmatmul.mubr.bf16.gmra.mxu0 %v1958_v7  ;;  %1186 = vmatmul.mubr.bf16.gmra.mxu1 %v2021_v8 }
 0x132   : > { %985 = vmatprep.mubr.bf16.mxu0 %v1959_v9  ;;  %1195 = vmatprep.mubr.bf16.mxu1 %v2022_v10 }
 0x139   : > { %986 = vmatmul.mubr.bf16.gmra.mxu0 %v1961_v11  ;;  %1196 = vmatmul.mubr.bf16.gmra.mxu1 %v2024_v12 }
 0x13a   : > { %995 = vmatprep.mubr.bf16.mxu0 %v1962_v13 }
 0x141   : > { %996 = vmatmul.mubr.bf16.gmra.mxu0 %v1964_v14 }
 0x142   : > { %1005 = vmatprep.mubr.bf16.mxu0 %v1965_v15 }
 0x149   : > { %1006 = vmatmul.mubr.bf16.gmra.mxu0 %v1967_v16 }
 0x14a   : > { %1015 = vmatprep.mubr.bf16.mxu0 %v1968_v17 }
 0x151   : > { %1016 = vmatmul.mubr.bf16.gmra.mxu0 %v1973_v18 }
 0x152   : > { %1025 = vmatprep.mubr.bf16.mxu0 %v1974_v19 }
 0x159   : > { %1026 = vmatmul.mubr.bf16.gmra.mxu0 %v1978_v20 }
 0x15a   : > { %1035 = vmatprep.mubr.bf16.mxu0 %v1980_v21 }
 0x161   : > { %1036 = vmatmul.mubr.bf16.gmra.mxu0 %v1984_v22 }
 0x162   : > { %1045 = vmatprep.mubr.bf16.mxu0 %v1989_v23 }
 0x169   : > { %1046 = vmatmul.mubr.bf16.gmra.mxu0 %v1991_v24 }
 0x16a   : > { %1055 = vmatprep.mubr.bf16.mxu0 %v1995_v25 }
 0x171   : > { %1056 = vmatmul.mubr.bf16.gmra.mxu0 %v1997_v26 }
 0x172   : > { %1065 = vmatprep.mubr.bf16.mxu0 %v2001_v27 }
 0x179   : > { %1066 = vmatmul.mubr.bf16.gmra.mxu0 %v2003_v28 }
 0x17a   : > { %1075 = vmatprep.mubr.bf16.mxu0 %v2007_v29 }
 0x181   : > { %1076 = vmatmul.mubr.bf16.gmra.mxu0 %v2009_v30 }
 0x182   : > { %1085 = vmatprep.mubr.bf16.mxu0 %v2013_v31 }
 0x189   : > { %1086 = vmatmul.mubr.bf16.gmra.mxu0 %v2015_v32 }
 0x1a9   : > { %v887_v39 = vpop.f32.mrf.mxu0  ;;  %v2714_v41 = vpop.f32.mrf.mxu1 }
 0x1aa   : > { %v888_v42 = vadd.f32 %v887_v39, %v2708_v38 }
 0x1ab   : > { %v889_v43 = vpop.f32.mrf.mxu0  ;;  %v2717_v44 = vpop.f32.mrf.mxu1 }
 0x1ac   : > { %v890_v45 = vadd.f32 %v889_v43, %v2712_v40  ;;  %2025 = vtanh.f32 %v888_v42 }
 0x1ad   : > { %v891_v46 = vpop.f32.mrf.mxu0  ;;  %v2720_v47 = vpop.f32.mrf.mxu1 }
 0x1ae   : > { %v892_v48 = vadd.f32 %v891_v46, %v2708_v38 }
 0x1af   : > { %v893_v49 = vpop.f32.mrf.mxu0  ;;  %v2723_v50 = vpop.f32.mrf.mxu1 }
 0x1b0   : > { %2027 = vtanh.f32 %v892_v48  ;;  %v894_v51 = vadd.f32 %v893_v49, %v2712_v40 }
 0x1b1   : > { %2029 = vtanh.f32 %v890_v45  ;;  %v897_v52 = vpop.f32.mrf.mxu0  ;;  %v2726_v53 = vpop.f32.mrf.mxu1 }
 0x1b2   : > { %2031 = vtanh.f32 %v894_v51  ;;  %v898_v54 = vadd.f32 %v897_v52, %v2708_v38 }
 0x1b3   : > { %v899_v55 = vpop.f32.mrf.mxu0  ;;  %v2729_v56 = vpop.f32.mrf.mxu1 }
 0x1b4   : > { %v900_v57 = vadd.f32 %v899_v55, %v2712_v40  ;;  %2033 = vtanh.f32 %v898_v54 }
 0x1b5   : > { %v901_v58 = vpop.f32.mrf.mxu0  ;;  %v2732_v59 = vpop.f32.mrf.mxu1 }
 0x1b6   : > { %v902_v60 = vadd.f32 %v901_v58, %v2708_v38 }
 0x1b7   : > { %v903_v61 = vpop.f32.mrf.mxu0  ;;  %v2735_v62 = vpop.f32.mrf.mxu1 }
 0x1b8   : > { %2035 = vtanh.f32 %v902_v60  ;;  %v904_v63 = vadd.f32 %v903_v61, %v2712_v40  ;;  %v2803_v61 = vld [vmem:[%s230_s7] sm:$0xf] }
 0x1b9   : > { %2037 = vtanh.f32 %v900_v57  ;;  %v2738_v0 = vpop.f32.mrf.mxu0  ;;  %v2740_v1 = vpop.f32.mrf.mxu1 }
 0x1ba   : > { %2039 = vtanh.f32 %v904_v63  ;;  %v2746_v4 = vpop.eup %2025 }
 0x1bb   : > { %v2742_v2 = vpop.f32.mrf.mxu0  ;;  %v2744_v3 = vpop.f32.mrf.mxu1 }
 0x1bd   : > { %v2748_v5 = vpop.eup %2027  ;;  %v2750_v6 = vpop.f32.mrf.mxu0 }
 0x1be   : > { %v2752_v7 = vpop.f32.mrf.mxu1  ;;  %v2754_v8 = vpop.eup %2029 }
 0x1bf   : > { %v2758_v10 = vpop.eup %2031  ;;  %v2760_v11 = vpop.f32.mrf.mxu0 }
 0x1c0   : > { %v2762_v12 = vpop.f32.mrf.mxu1 }
 0x1c1   : > { %v2766_v14 = vpop.f32.mrf.mxu0  ;;  %v2770_v18 = vpop.eup %2033 }
 0x1c2   : > { %v1127_v15 = vpop.f32.mrf.mxu1 }
 0x1c3   : > { %v2768_v16 = vpop.f32.mrf.mxu0  ;;  %v1128_v19 = vadd.f32 %v1127_v15, %v2708_v38 }
 0x1c4   : > { %v1129_v17 = vpop.f32.mrf.mxu1 }
 0x1c5   : > { %v2773_v20 = vpop.eup %2035  ;;  %v921_v21 = vpop.f32.mrf.mxu0  ;;  %v1130_v22 = vadd.f32 %v1129_v17, %v2712_v40  ;;  %2041 = vtanh.f32 %v1128_v19  ;;  %v2808_v19 = vadd.s32 8, %v2699_v34 }
 0x1c6   : > { %v1131_v23 = vpop.f32.mrf.mxu1  ;;  %v2776_v24 = vpop.eup %2037 }
 0x1c7   : > { %v1132_v26 = vadd.f32 %v1131_v23, %v2708_v38  ;;  %v2781_v27 = vpop.eup %2039  ;;  %v923_v28 = vpop.f32.mrf.mxu0  ;;  %2043 = vtanh.f32 %v1130_v22  ;;  %v1345_v22 = vrot.slane %v2803_v61, %v369_v37 }
 0x1c8   : > { %v1133_v29 = vpop.f32.mrf.mxu1 }
 0x1c9   : > { %v1134_v31 = vadd.f32 %v1133_v29, %v2712_v40  ;;  %v2786_v32 = vpop.f32.mrf.mxu0  ;;  %2045 = vtanh.f32 %v1132_v26  ;;  %vm1355_vm0 = vcmp.eq.s32.totalorder %v2699_v34, %v1345_v22  ;;  %vm1359_vm1 = vcmp.eq.s32.totalorder %v2808_v19, %v1345_v22 }
 0x1ca   : > { %v1137_v33 = vpop.f32.mrf.mxu1  ;;  %vm1765_vm2 = vmpackc.low %vm1359_vm1, %vm1355_vm0 }
 0x1cb   : > { %v2788_v36 = vpop.f32.mrf.mxu0  ;;  %2047 = vtanh.f32 %v1134_v31  ;;  %v1138_v39 = vadd.f32 %v1137_v33, %v2708_v38 }
 0x1cc   : > { %v1139_v42 = vpop.f32.mrf.mxu1 }
 0x1cd   : > { %v1140_v43 = vadd.f32 %v1139_v42, %v2712_v40  ;;  %v2792_v45 = vpop.f32.mrf.mxu0  ;;  %2049 = vtanh.f32 %v1138_v39  ;;  %v3243_v42 = vmov 1.0|1.0  }
 0x1ce   : > { %v1141_v46 = vpop.f32.mrf.mxu1  ;;  %1766 = vmatprep.mubr.msk.bf16.mxu1 %vm1765_vm2, %v3243_v42 }
 0x1cf   : > { %v1142_v48 = vadd.f32 %v1141_v46, %v2708_v38  ;;  %v933_v49 = vpop.f32.mrf.mxu0  ;;  %2051 = vtanh.f32 %v1140_v43  ;;  %v914_v43 = vadd.f32 %v2760_v11, %v2712_v40 }
 0x1d0   : > { %v1143_v51 = vpop.f32.mrf.mxu1  ;;  %v934_v11 = vadd.f32 %v933_v49, %v2712_v40 }
 0x1d1   : > { %v1144_v52 = vadd.f32 %v1143_v51, %v2712_v40  ;;  %v2796_v54 = vpop.f32.mrf.mxu0  ;;  %2053 = vtanh.f32 %v1142_v48 }
 0x1d2   : > { %v1147_v55 = vpop.f32.mrf.mxu1  ;;  %v2805_v63 = vpop.eup %2041 }
 0x1d3   : > { %v939_v57 = vpop.f32.mrf.mxu0  ;;  %2055 = vtanh.f32 %v1144_v52  ;;  %v1148_v58 = vadd.f32 %v1147_v55, %v2708_v38  ;;  %3266 = vst [vmem:[#allocation15_spill] sm:$0xff] %v2805_v63  ;;  %v920_v52 = vadd.f32 %v2768_v16, %v2712_v40 }
 0x1d4   : > { %v2799_v60 = vpop.f32.mrf.mxu1  ;;  %v2813_v23 = vpop.eup %2043  ;;  %v940_v16 = vadd.f32 %v939_v57, %v2712_v40 }
 0x1d5   : > { %3265 = vst [vmem:[#allocation14_spill] sm:$0xff] %v2799_v60  ;;  %v941_v15 = vpop.f32.mrf.mxu0  ;;  %3267 = vst [vmem:[#allocation16_spill] sm:$0xff] %v2813_v23  ;;  %2057 = vtanh.f32 %v1148_v58  ;;  %v922_v58 = vadd.f32 %v921_v21, %v2708_v38 }
 0x1d6   : > { %v1151_v17 = vpop.f32.mrf.mxu1  ;;  %v2816_v29 = vpop.eup %2045  ;;  %v942_v21 = vadd.f32 %v941_v15, %v2708_v38 }
 0x1d7   : > { %v1152_v26 = vadd.f32 %v1151_v17, %v2708_v38  ;;  %3268 = vst [vmem:[#allocation17_spill] sm:$0xff] %v2816_v29  ;;  %v943_v31 = vpop.f32.mrf.mxu0 }
 0x1d8   : > { %v2820_v33 = vpop.eup %2047 }
 0x1d9   : > { %3269 = vst [vmem:[#allocation18_spill] sm:$0xff] %v2820_v33  ;;  %v947_v39 = vpop.f32.mrf.mxu0  ;;  %2059 = vtanh.f32 %v1152_v26  ;;  %v924_v26 = vadd.f32 %v923_v28, %v2712_v40  ;;  %v944_v28 = vadd.f32 %v943_v31, %v2712_v40 }
 0x1da   : > { %v2829_v51 = vpop.eup %2049  ;;  %2061 = vtanh.f32 %v914_v43 }
 0x1db   : > { %v949_v46 = vpop.f32.mrf.mxu0  ;;  %3270 = vst [vmem:[#allocation19_spill] sm:$0xff] %v2829_v51  ;;  %2063 = vtanh.f32 %v920_v52 }
 0x1dc   : > { %v2833_v55 = vpop.eup %2051  ;;  %2065 = vtanh.f32 %v922_v58 }
 0x1dd   : > { %3271 = vst [vmem:[#allocation20_spill] sm:$0xff] %v2833_v55  ;;  %v951_v17 = vpop.f32.mrf.mxu0  ;;  %2067 = vtanh.f32 %v924_v26 }
 0x1de   : > { %v2836_v22 = vpop.eup %2053  ;;  %2069 = vtanh.f32 %v934_v11  ;;  %v950_v11 = vadd.f32 %v949_v46, %v2712_v40 }
 0x1df   : > { %3272 = vst [vmem:[#allocation21_spill] sm:$0xff] %v2836_v22  ;;  %v953_v37 = vpop.f32.mrf.mxu0  ;;  %2071 = vtanh.f32 %v940_v16 }
 0x1e0   : > { %v2842_v42 = vpop.eup %2055  ;;  %v954_v49 = vadd.f32 %v953_v37, %v2712_v40  ;;  %2073 = vtanh.f32 %v942_v21  ;;  %v952_v21 = vadd.f32 %v951_v17, %v2708_v38 }
 0x1e1   : > { %3273 = vst [vmem:[#allocation22_spill] sm:$0xff] %v2842_v42  ;;  %v957_v35 = vpop.f32.mrf.mxu0  ;;  %2075 = vtanh.f32 %v944_v28  ;;  %v948_v28 = vadd.f32 %v947_v39, %v2708_v38 }
 0x1e2   : > { %v2850_v48 = vpop.eup %2057  ;;  %2077 = vtanh.f32 %v954_v49  ;;  %v958_v26 = vadd.f32 %v957_v35, %v2708_v38 }
 0x1e3   : > { %v959_v43 = vpop.f32.mrf.mxu0  ;;  %3274 = vst [vmem:[#allocation23_spill] sm:$0xff] %v2850_v48 }
 0x1e4   : > { %v960_v52 = vadd.f32 %v959_v43, %v2712_v40 }
 0x1e5   : > { %v961_v57 = vpop.f32.mrf.mxu0 }
 0x1e6   : > { %v2853_v58 = vpop.eup %2059  ;;  %v962_v15 = vadd.f32 %v961_v57, %v2708_v38  ;;  %2079 = vtanh.f32 %v960_v52 }
 0x1e7   : > { %3275 = vst [vmem:[#allocation24_spill] sm:$0xff] %v2853_v58  ;;  %v963_v31 = vpop.f32.mrf.mxu0  ;;  %v2864_v57 = vpop.eup %2061 }
 0x1e8   : > { %v964_v16 = vadd.f32 %v963_v31, %v2712_v40  ;;  %2081 = vtanh.f32 %v962_v15  ;;  %v2866_v9 = vpop.eup %2063  ;;  %v938_v15 = vadd.f32 %v2796_v54, %v2708_v38  ;;  %v928_v54 = vadd.f32 %v2786_v32, %v2708_v38 }
 0x1e9   : > { %v967_v43 = vpop.f32.mrf.mxu0  ;;  %v2869_v31 = vpop.eup %2065  ;;  %v918_v32 = vadd.f32 %v2766_v14, %v2708_v38 }
 0x1ea   : > { %2083 = vtanh.f32 %v964_v16  ;;  %v968_v49 = vadd.f32 %v967_v43, %v2708_v38  ;;  %v2872_v39 = vpop.eup %2067 }
 0x1eb   : > { %2085 = vtanh.f32 %v958_v26  ;;  %v969_v35 = vpop.f32.mrf.mxu0  ;;  %v2876_v16 = vpop.eup %2069 }
 0x1ec   : > { %2087 = vtanh.f32 %v950_v11  ;;  %v970_v46 = vadd.f32 %v969_v35, %v2712_v40  ;;  %v930_v11 = vadd.f32 %v2788_v36, %v2712_v40  ;;  %v2072_v43 = vpop.eup %2071 }
 0x1ed   : > { %2089 = vtanh.f32 %v952_v21  ;;  %v971_v52 = vpop.f32.mrf.mxu0 }
 0x1ee   : > { %2091 = vtanh.f32 %v948_v28  ;;  %v972_v17 = vadd.f32 %v971_v52, %v2708_v38  ;;  %v932_v28 = vadd.f32 %v2792_v45, %v2708_v38  ;;  %v2883_v52 = vpop.eup %2073 }
 0x1ef   : > { %2093 = vtanh.f32 %v968_v49  ;;  %v973_v26 = vpop.f32.mrf.mxu0  ;;  %v2076_v49 = vpop.eup %2075 }
 0x1f0   : > { %2095 = vtanh.f32 %v972_v17  ;;  %v974_v21 = vadd.f32 %v973_v26, %v2712_v40  ;;  %v2078_v17 = vpop.eup %2077 }
 0x1f1   : > { %2097 = vtanh.f32 %v970_v46  ;;  %v977_v35 = vpop.f32.mrf.mxu0 }
 0x1f2   : > { %2099 = vtanh.f32 %v974_v21  ;;  %v978_v37 = vadd.f32 %v977_v35, %v2708_v38  ;;  %v910_v35 = vadd.f32 %v2742_v2, %v2712_v40  ;;  %v908_v2 = vadd.f32 %v2738_v0, %v2708_v38 }
 0x1f3   : > { %2101 = vtanh.f32 %v938_v15  ;;  %v979_v36 = vpop.f32.mrf.mxu0  ;;  %v2080_v26 = vpop.eup %2079 }
 0x1f4   : > { %2103 = vtanh.f32 %v930_v11  ;;  %v980_v13 = vadd.f32 %v979_v36, %v2712_v40 }
 0x1f5   : > { %2105 = vtanh.f32 %v932_v28  ;;  %v981_v45 = vpop.f32.mrf.mxu0  ;;  %v2082_v46 = vpop.eup %2081 }
 0x1f6   : > { %2107 = vtanh.f32 %v928_v54  ;;  %v982_v25 = vadd.f32 %v981_v45, %v2708_v38  ;;  %v912_v54 = vadd.f32 %v2750_v6, %v2708_v38 }
 0x1f7   : > { %v2084_v30 = vpop.eup %2083  ;;  %2109 = vtanh.f32 %v978_v37  ;;  %v983_v15 = vpop.f32.mrf.mxu0 }
 0x1f8   : > { %v2086_v21 = vpop.eup %2085  ;;  %2111 = vtanh.f32 %v982_v25  ;;  %v984_v11 = vadd.f32 %v983_v15, %v2712_v40  ;;  %v1401_v28 = vpack.c.bf16 %v2084_v30, %v2080_v26 }
 0x1f9   : > { %v2088_v36 = vpop.eup %2087  ;;  %2113 = vtanh.f32 %v980_v13  ;;  %v2897_v45 = vpop.f32.mrf.mxu0  ;;  %v1400_v63 = vpack.c.bf16 %v2082_v46, %v2086_v21 }
 0x1fa   : > { %v2090_v29 = vpop.eup %2089  ;;  %2115 = vtanh.f32 %v984_v11  ;;  %1450 = vmatprep.subr.bf16.mxu1 %v1401_v28  ;;  %v1399_v14 = vpack.c.bf16 %v2078_v17, %v2088_v36  ;;  %v1397_v17 = vpack.c.bf16 %v2076_v49, %v2072_v43 }
 0x1fb   : > { %v2092_v37 = vpop.eup %2091  ;;  %2117 = vtanh.f32 %v918_v32  ;;  %v2901_v25 = vpop.f32.mrf.mxu0  ;;  %1451 = vmatpush1.bf16.msra.mxu1 %v1400_v63 }
 0x1fc   : > { %v2903_v30 = vpop.eup %2093  ;;  %2119 = vtanh.f32 %v910_v35  ;;  %1452 = vmatprep.subr.bf16.mxu1 %v1399_v14  ;;  %v1398_v26 = vpack.c.bf16 %v2090_v29, %v2092_v37  ;;  %v2927_v14 = vpop.f32.mrf.mxu1 }
 0x1fd   : > { %v2905_v6 = vpop.eup %2095  ;;  %2121 = vtanh.f32 %v912_v54  ;;  %v2907_v13 = vpop.f32.mrf.mxu0  ;;  %3276 = vst [vmem:[#allocation25_spill] sm:$0xff] %v2927_v14 }
 0x1fe   : > { %v2909_v46 = vpop.eup %2097  ;;  %2123 = vtanh.f32 %v908_v2 }
 0x1ff   : > { %v2913_v32 = vpop.eup %2099  ;;  %v2915_v63 = vpop.f32.mrf.mxu0  ;;  %1453 = vmatpush1.bf16.msra.mxu1 %v1398_v26 }
 0x200   : > { %v2102_v15 = vpop.eup %2101  ;;  %1454 = vmatprep.subr.bf16.mxu1 %v1397_v17 }
 0x201   : > { %v2104_v35 = vpop.eup %2103  ;;  %v2919_v11 = vpop.f32.mrf.mxu0  ;;  %v1396_v29 = vpack.c.bf16 %v2883_v52, %v2102_v15  ;;  %v1393_v52 = vpack.c.bf16 %v2872_v39, %v2866_v9 }
 0x202   : > { %v2106_v43 = vpop.eup %2105  ;;  %v1395_v49 = vpack.c.bf16 %v2876_v16, %v2104_v35 }
 0x203   : > { %v2108_v28 = vpop.eup %2107  ;;  %v2923_v36 = vpop.f32.mrf.mxu0  ;;  %1455 = vmatpush1.bf16.msra.mxu1 %v1396_v29 }
 0x204   : > { %v2925_v54 = vpop.eup %2109  ;;  %1456 = vmatprep.subr.bf16.mxu1 %v1395_v49  ;;  %v1394_v26 = vpack.c.bf16 %v2106_v43, %v2108_v28  ;;  %v2943_v49 = vpop.f32.mrf.mxu1  ;;  %v3278_v43 = vpack.c.bf16 %v2781_v27, %v2776_v24  ;;  %v3283_v24 = vpack.c.bf16 %v2748_v5, %v2746_v4 }
 0x205   : > { %v2929_v37 = vpop.eup %2111  ;;  %v2931_v2 = vpop.f32.mrf.mxu0  ;;  %3277 = vst [vmem:[#allocation26_spill] sm:$0xff] %v2943_v49 }
 0x206   : > { %v2933_v17 = vpop.eup %2113 }
 0x207   : > { %v2939_v15 = vpop.eup %2115  ;;  %v2941_v35 = vpop.f32.mrf.mxu0  ;;  %1457 = vmatpush1.bf16.msra.mxu1 %v1394_v26 }
 0x208   : > { %v2118_v29 = vpop.eup %2117  ;;  %1458 = vmatprep.subr.bf16.mxu1 %v1393_v52  ;;  %v2951_v26 = vpop.f32.mrf.mxu1 }
 0x209   : > { %v2120_v28 = vpop.eup %2119  ;;  %v2947_v0 = vpop.f32.mrf.mxu0  ;;  %v1392_v9 = vpack.c.bf16 %v2869_v31, %v2118_v29 }
 0x20a   : > { %v2122_v39 = vpop.eup %2121  ;;  %v1391_v21 = vpack.c.bf16 %v2864_v57, %v2120_v28  ;;  %v2956_v22 = vpop.f32.mrf.mxu1  ;;  %v3280_v57 = vpack.c.bf16 %v2773_v20, %v2770_v18 }
 0x20b   : > { %v1009_v16 = vpop.f32.mrf.mxu0  ;;  %1459 = vmatpush1.bf16.msra.mxu1 %v1392_v9  ;;  %v2124_v23 = vpop.eup %2123  ;;  %3279 = vst [vmem:[#allocation27_spill] sm:$0xff] %v2956_v22 }
 0x20c   : > { %1460 = vmatprep.subr.bf16.mxu1 %v1391_v21  ;;  %v1390_v33 = vpack.c.bf16 %v2122_v39, %v2124_v23  ;;  %v3281_v21 = vpack.c.bf16 %v2758_v10, %v2754_v8  ;;  %v2964_v28 = vpop.f32.mrf.mxu1 }
 0x20d   : > { %v1011_v52 = vpop.f32.mrf.mxu0  ;;  %3282 = vst [vmem:[#allocation28_spill] sm:$0xff] %v2964_v28 }
 0x20e   : > { %v2969_v27 = vpop.f32.mrf.mxu1 }
 0x20f   : > { %v1013_v51 = vpop.f32.mrf.mxu0  ;;  %1461 = vmatpush1.bf16.msra.mxu1 %v1390_v33 }
 0x210   : > { %1462 = vmatprep.subr.bf16.mxu1 %v3278_v43  ;;  %v2971_v39 = vpop.f32.mrf.mxu1 }
 0x211   : > { %v1017_v31 = vpop.f32.mrf.mxu0 }
 0x213   : > { %v1019_v29 = vpop.f32.mrf.mxu0  ;;  %1463 = vmatpush1.bf16.msra.mxu1 %v3280_v57  ;;  %v2973_v57 = vpop.f32.mrf.mxu1 }
 0x214   : > { %1464 = vmatprep.subr.bf16.mxu1 %v3281_v21  ;;  %3284 = vst [vmem:[#allocation29_spill] sm:$0xff] %v2973_v57 }
 0x215   : > { %v1021_v23 = vpop.f32.mrf.mxu0  ;;  %v2977_v42 = vpop.f32.mrf.mxu1 }
 0x217   : > { %v1023_v33 = vpop.f32.mrf.mxu0  ;;  %1465 = vmatpush1.bf16.msra.mxu1 %v3283_v24  ;;  %v2983_v22 = vpop.f32.mrf.mxu1 }
 0x218   : > { %v1024_v49 = vadd.f32 %v1023_v33, %v2712_v40 }
 0x219   : > { %v1027_v43 = vpop.f32.mrf.mxu0 }
 0x21b   : > { %v1029_v9 = vpop.f32.mrf.mxu0 }
 0x21c   : > { %v1030_v58 = vadd.f32 %v1029_v9, %v2712_v40  ;;  %v1020_v9 = vadd.f32 %v1019_v29, %v2712_v40 }
 0x21d   : > { %v1031_v18 = vpop.f32.mrf.mxu0 }
 0x21f   : > { %v1033_v20 = vpop.f32.mrf.mxu0 }
 0x220   : > { %v1034_v10 = vadd.f32 %v1033_v20, %v2712_v40  ;;  %v1032_v20 = vadd.f32 %v1031_v18, %v2708_v38 }
 0x221   : > { %v1037_v8 = vpop.f32.mrf.mxu0 }
 0x222   : > { %2125 = vtanh.f32 %v1034_v10  ;;  %v1038_v24 = vadd.f32 %v1037_v8, %v2708_v38  ;;  %v1028_v10 = vadd.f32 %v1027_v43, %v2708_v38  ;;  %v1010_v43 = vadd.f32 %v1009_v16, %v2712_v40 }
 0x223   : > { %v1039_v21 = vpop.f32.mrf.mxu0  ;;  %v1000_v16 = vadd.f32 %v2923_v36, %v2712_v40 }
 0x224   : > { %v1040_v55 = vadd.f32 %v1039_v21, %v2712_v40 }
 0x225   : > { %v1041_v4 = vpop.f32.mrf.mxu0 }
 0x226   : > { %v1042_v5 = vadd.f32 %v1041_v4, %v2708_v38  ;;  %2127 = vtanh.f32 %v1040_v55  ;;  %v2993_v55 = vpop.f32.mrf.mxu1  ;;  %v1014_v4 = vadd.f32 %v1013_v51, %v2712_v40  ;;  %v1008_v51 = vadd.f32 %v2947_v0, %v2708_v38 }
 0x227   : > { %v1043_v48 = vpop.f32.mrf.mxu0  ;;  %v994_v0 = vadd.f32 %v2915_v63, %v2712_v40  ;;  %v992_v63 = vadd.f32 %v2907_v13, %v2708_v38 }
 0x228   : > { %v1044_v14 = vadd.f32 %v1043_v48, %v2712_v40  ;;  %2129 = vtanh.f32 %v1042_v5  ;;  %v1022_v48 = vadd.f32 %v1021_v23, %v2708_v38  ;;  %v3003_v29 = vpop.f32.mrf.mxu1  ;;  %v1004_v5 = vadd.f32 %v2941_v35, %v2712_v40 }
 0x229   : > { %v2986_v21 = vpop.f32.mrf.mxu0 }
 0x22a   : > { %2131 = vtanh.f32 %v1044_v14  ;;  %v1018_v14 = vadd.f32 %v1017_v31, %v2708_v38 }
 0x22b   : > { %2133 = vtanh.f32 %v1038_v24  ;;  %v2990_v8 = vpop.f32.mrf.mxu0  ;;  %v3016_v24 = vpop.f32.mrf.mxu1 }
 0x22c   : > { %2135 = vtanh.f32 %v1030_v58  ;;  %v1012_v58 = vadd.f32 %v1011_v52, %v2708_v38 }
 0x22d   : > { %2137 = vtanh.f32 %v1032_v20  ;;  %v2996_v18 = vpop.f32.mrf.mxu0  ;;  %v1002_v20 = vadd.f32 %v2931_v2, %v2708_v38 }
 0x22e   : > { %2139 = vtanh.f32 %v1024_v49 }
 0x22f   : > { %2141 = vtanh.f32 %v1028_v10  ;;  %v3000_v33 = vpop.f32.mrf.mxu0  ;;  %v2126_v31 = vpop.eup %2125 }
 0x230   : > { %2143 = vtanh.f32 %v1020_v9 }
 0x231   : > { %2145 = vtanh.f32 %v1022_v48  ;;  %v3006_v23 = vpop.f32.mrf.mxu0  ;;  %v998_v48 = vadd.f32 %v2919_v11, %v2708_v38 }
 0x232   : > { %2147 = vtanh.f32 %v1014_v4 }
 0x233   : > { %2149 = vtanh.f32 %v1018_v14  ;;  %v3012_v49 = vpop.f32.mrf.mxu0  ;;  %v2128_v52 = vpop.eup %2127  ;;  %v990_v14 = vadd.f32 %v2901_v25, %v2712_v40  ;;  %v988_v25 = vadd.f32 %v2897_v45, %v2708_v38 }
 0x234   : > { %2151 = vtanh.f32 %v1010_v43  ;;  %v3030_v43 = vpop.f32.mrf.mxu1 }
 0x235   : > { %2153 = vtanh.f32 %v1012_v58  ;;  %v3020_v35 = vpop.f32.mrf.mxu0  ;;  %v2130_v10 = vpop.eup %2129 }
 0x236   : > { %2155 = vtanh.f32 %v1004_v5  ;;  %v3040_v13 = vpop.f32.mrf.mxu1 }
 0x237   : > { %v2132_v9 = vpop.eup %2131  ;;  %2157 = vtanh.f32 %v1008_v51  ;;  %v3026_v36 = vpop.f32.mrf.mxu0 }
 0x238   : > { %v2134_v4 = vpop.eup %2133  ;;  %2159 = vtanh.f32 %v1000_v16  ;;  %v1417_v2 = vpack.c.bf16 %v2132_v9, %v2128_v52 }
 0x239   : > { %v2136_v58 = vpop.eup %2135  ;;  %2161 = vtanh.f32 %v1002_v20  ;;  %v1416_v5 = vpack.c.bf16 %v2130_v10, %v2134_v4  ;;  %v3034_v60 = vpop.f32.mrf.mxu0 }
 0x23a   : > { %v2138_v11 = vpop.eup %2137  ;;  %2163 = vtanh.f32 %v994_v0  ;;  %1466 = vmatprep.subr.bf16.mxu1 %v1417_v2  ;;  %v1415_v51 = vpack.c.bf16 %v2126_v31, %v2136_v58  ;;  %v3046_v2 = vpop.f32.mrf.mxu1  ;;  %v1120_v58 = vadd.f32 %v2744_v3, %v2712_v40 }
 0x23b   : > { %v2140_v28 = vpop.eup %2139  ;;  %2165 = vtanh.f32 %v998_v48  ;;  %1467 = vmatpush2.bf16.msra.mxu1 %v1416_v5  ;;  %v3038_v16 = vpop.f32.mrf.mxu0 }
 0x23c   : > { %v2142_v52 = vpop.eup %2141  ;;  %2167 = vtanh.f32 %v990_v14  ;;  %1468 = vmatprep.subr.bf16.mxu1 %v1415_v51  ;;  %v3060_v3 = vpop.f32.mrf.mxu1 }
 0x23d   : > { %v2144_v20 = vpop.eup %2143  ;;  %2169 = vtanh.f32 %v992_v63  ;;  %v1414_v10 = vpack.c.bf16 %v2138_v11, %v2142_v52  ;;  %v3042_v9 = vpop.f32.mrf.mxu0  ;;  %v1110_v52 = vadd.f32 %v2729_v56, %v2712_v40  ;;  %v1114_v56 = vadd.f32 %v2735_v62, %v2712_v40 }
 0x23e   : > { %v2146_v0 = vpop.eup %2145  ;;  %v1413_v31 = vpack.c.bf16 %v2140_v28, %v2144_v20  ;;  %2171 = vtanh.f32 %v988_v25  ;;  %v1124_v28 = vadd.f32 %v2762_v12, %v2712_v40  ;;  %v1122_v12 = vadd.f32 %v2752_v7, %v2708_v38 }
 0x23f   : > { %v2148_v4 = vpop.eup %2147  ;;  %1469 = vmatpush2.bf16.msra.mxu1 %v1414_v10  ;;  %v3044_v45 = vpop.f32.mrf.mxu0  ;;  %2173 = vtanh.f32 %v1120_v58  ;;  %v1108_v7 = vadd.f32 %v2726_v53, %v2708_v38  ;;  %v1112_v62 = vadd.f32 %v2732_v59, %v2708_v38  ;;  %v1098_v53 = vadd.f32 %v2714_v41, %v2708_v38 }
 0x240   : > { %v2150_v48 = vpop.eup %2149  ;;  %1470 = vmatprep.subr.bf16.mxu1 %v1413_v31  ;;  %v1118_v31 = vadd.f32 %v2740_v1, %v2708_v38  ;;  %2175 = vtanh.f32 %v1124_v28  ;;  %v1100_v1 = vadd.f32 %v2717_v44, %v2712_v40  ;;  %v1104_v44 = vadd.f32 %v2723_v50, %v2712_v40 }
 0x241   : > { %v2152_v14 = vpop.eup %2151  ;;  %v1412_v5 = vpack.c.bf16 %v2146_v0, %v2150_v48  ;;  %v3050_v63 = vpop.f32.mrf.mxu0  ;;  %2177 = vtanh.f32 %v1110_v52 }
 0x242   : > { %v2154_v11 = vpop.eup %2153  ;;  %v1411_v51 = vpack.c.bf16 %v2148_v4, %v2152_v14  ;;  %2179 = vtanh.f32 %v1118_v31 }
 0x243   : > { %v2156_v25 = vpop.eup %2155  ;;  %1471 = vmatpush2.bf16.msra.mxu1 %v1412_v5  ;;  %v3056_v20 = vpop.f32.mrf.mxu0  ;;  %2181 = vtanh.f32 %v1122_v12 }
 0x244   : > { %v2158_v10 = vpop.eup %2157  ;;  %1472 = vmatprep.subr.bf16.mxu1 %v1411_v51  ;;  %2183 = vtanh.f32 %v1114_v56 }
 0x245   : > { %v2160_v0 = vpop.eup %2159  ;;  %v1410_v4 = vpack.c.bf16 %v2154_v11, %v2158_v10  ;;  %v3064_v48 = vpop.f32.mrf.mxu0  ;;  %2185 = vtanh.f32 %v1100_v1 }
 0x246   : > { %v2162_v14 = vpop.eup %2161  ;;  %v1409_v5 = vpack.c.bf16 %v2156_v25, %v2160_v0  ;;  %v3072_v11 = vpop.f32.mrf.mxu1  ;;  %2187 = vtanh.f32 %v1108_v7  ;;  %v3286_v7 = vsub.s32 0, %v2699_v34 }
 0x247   : > { %v2164_v57 = vpop.eup %2163  ;;  %1473 = vmatpush2.bf16.msra.mxu1 %v1410_v4  ;;  %v1083_v51 = vpop.f32.mrf.mxu0  ;;  %2189 = vtanh.f32 %v1112_v62 }
 0x248   : > { %v2166_v58 = vpop.eup %2165  ;;  %1474 = vmatprep.subr.bf16.mxu1 %v1409_v5  ;;  %v1102_v5 = vadd.f32 %v2720_v47, %v2708_v38  ;;  %v1199_v59 = vpop.f32.mrf.mxu1  ;;  %2191 = vtanh.f32 %v1104_v44  ;;  %v3285_v47 = vpack.c.bf16 %v2939_v15, %v2933_v17  ;;  %v1078_v17 = vadd.f32 %v3050_v63, %v2708_v38 }
 0x249   : > { %v2168_v10 = vpop.eup %2167  ;;  %v1408_v28 = vpack.c.bf16 %v2162_v14, %v2166_v58  ;;  %v1087_v25 = vpop.f32.mrf.mxu0  ;;  %v1200_v50 = vadd.f32 %v1199_v59, %v2712_v40  ;;  %2193 = vtanh.f32 %v1098_v53  ;;  %v3287_v15 = vpack.c.bf16 %v2929_v37, %v2925_v54 }
 0x24a   : > { %v2170_v0 = vpop.eup %2169  ;;  %v1407_v52 = vpack.c.bf16 %v2164_v57, %v2168_v10  ;;  %v1352_v57 = vsub.s32 3, %v2699_v34  ;;  %v1088_v41 = vadd.f32 %v1087_v25, %v2708_v38  ;;  %2195 = vtanh.f32 %v1102_v5 }
 0x24b   : > { %1475 = vmatpush2.bf16.msra.mxu1 %v1408_v28  ;;  %v1089_v31 = vpop.f32.mrf.mxu0  ;;  %v2172_v4 = vpop.eup %2171  ;;  %v1341_v10 = vrot.slane %v2803_v61, %v3286_v7  ;;  %2197 = vtanh.f32 %v1200_v50  ;;  %v1080_v53 = vadd.f32 %v3056_v20, %v2712_v40  ;;  %v1082_v63 = vadd.f32 %v3064_v48, %v2708_v38 }
 0x24c   : > { %1476 = vmatprep.subr.bf16.mxu1 %v1407_v52  ;;  %v1406_v12 = vpack.c.bf16 %v2170_v0, %v2172_v4  ;;  %v1090_v1 = vadd.f32 %v1089_v31, %v2712_v40  ;;  %v1353_v28 = vrot.slane %v2803_v61, %v1352_v57  ;;  %v2174_v25 = vpop.eup %2173  ;;  %v1084_v0 = vadd.f32 %v1083_v51, %v2712_v40  ;;  %v1201_v50 = vpop.f32.mrf.mxu1 }
 0x24d   : > { %v1091_v14 = vpop.f32.mrf.mxu0  ;;  %v2176_v44 = vpop.eup %2175  ;;  %v3288_v61 = vpack.c.bf16 %v2913_v32, %v2909_v46  ;;  %vm1354_vm3 = vcmp.eq.s32.totalorder %v2699_v34, %v1341_v10  ;;  %vm1358_vm4 = vcmp.eq.s32.totalorder %v2808_v19, %v1341_v10  ;;  %v1074_v37 = vadd.f32 %v3044_v45, %v2712_v40 }
 0x24e   : > { %v1092_v62 = vadd.f32 %v1091_v14, %v2708_v38  ;;  %v2178_v52 = vpop.eup %2177  ;;  %vm1357_vm5 = vcmp.eq.s32.totalorder %v2699_v34, %v1353_v28  ;;  %vm1361_vm6 = vcmp.eq.s32.totalorder %v2808_v19, %v1353_v28  ;;  %v1433_v46 = vpack.c.bf16 %v2176_v44, %v2174_v25  ;;  %vm1767_vm7 = vmpackc.low %vm1358_vm4, %vm1354_vm3 }
 0x24f   : > { %1477 = vmatpush2.bf16.msra.mxu1 %v1406_v12  ;;  %v1093_v56 = vpop.f32.mrf.mxu0  ;;  %v2180_v51 = vpop.eup %2179  ;;  %v1068_v20 = vadd.f32 %v3034_v60, %v2708_v38  ;;  %v3289_v31 = vpack.c.bf16 %v2905_v6, %v2903_v30  ;;  %v1070_v4 = vadd.f32 %v3038_v16, %v2712_v40  ;;  %vm1769_vm8 = vmpackc.low %vm1361_vm6, %vm1357_vm5  ;;  %v1072_v60 = vadd.f32 %v3042_v9, %v2708_v38 }
 0x250   : > { %1478 = vmatprep.subr.bf16.mxu1 %v3285_v47  ;;  %v1094_v58 = vadd.f32 %v1093_v56, %v2712_v40  ;;  %v2182_v54 = vpop.eup %2181  ;;  %v1064_v6 = vadd.f32 %v3026_v36, %v2712_v40  ;;  %v3290_v59 = vmov 1.0|1.0   ;;  %v1058_v14 = vadd.f32 %v3006_v23, %v2708_v38 }
 0x251   : > { %v2184_v32 = vpop.eup %2183  ;;  %v1432_v5 = vpack.c.bf16 %v2182_v54, %v2180_v51  ;;  %v1060_v57 = vadd.f32 %v3012_v49, %v2712_v40  ;;  %v1054_v23 = vadd.f32 %v3000_v33, %v2712_v40  ;;  %v1048_v7 = vadd.f32 %v2986_v21, %v2708_v38  ;;  %v1203_v49 = vpop.f32.mrf.mxu1 }
 0x252   : > { %2199 = vtanh.f32 %v1094_v58  ;;  %v2186_v48 = vpop.eup %2185  ;;  %v1431_v12 = vpack.c.bf16 %v2184_v32, %v2178_v52  ;;  %v1052_v28 = vadd.f32 %v2996_v18, %v2708_v38  ;;  %v1204_v21 = vadd.f32 %v1203_v49, %v2712_v40  ;;  %v3295_v49 = vld [vmem:[#allocation27_spill] sm:$0xff] }
 0x253   : > { %2201 = vtanh.f32 %v1088_v41  ;;  %1479 = vmatpush2.bf16.msra.mxu1 %v3287_v15  ;;  %v2188_v45 = vpop.eup %2187  ;;  %v1062_v41 = vadd.f32 %v3020_v35, %v2708_v38  ;;  %v1050_v35 = vadd.f32 %v2990_v8, %v2712_v40  ;;  %v1198_v15 = vadd.f32 %v3072_v11, %v2708_v38 }
 0x254   : > { %2203 = vtanh.f32 %v1090_v1  ;;  %1480 = vmatprep.subr.bf16.mxu1 %v3288_v61  ;;  %v2190_v30 = vpop.eup %2189  ;;  %v1202_v52 = vadd.f32 %v1201_v50, %v2708_v38  ;;  %v1194_v51 = vadd.f32 %v3060_v3, %v2712_v40  ;;  %v1188_v11 = vadd.f32 %v3030_v43, %v2708_v38 }
 0x255   : > { %2205 = vtanh.f32 %v1092_v62  ;;  %v2192_v16 = vpop.eup %2191  ;;  %v1430_v56 = vpack.c.bf16 %v2190_v30, %v2188_v45  ;;  %v1192_v32 = vadd.f32 %v3046_v2, %v2708_v38  ;;  %v1178_v45 = vadd.f32 %v2983_v22, %v2708_v38 }
 0x256   : > { %2207 = vtanh.f32 %v1084_v0  ;;  %v2194_v9 = vpop.eup %2193  ;;  %v1429_v47 = vpack.c.bf16 %v2192_v16, %v2186_v48  ;;  %v1174_v30 = vadd.f32 %v2977_v42, %v2712_v40  ;;  %v1168_v16 = vadd.f32 %v2969_v27, %v2708_v38 }
 0x257   : > { %2209 = vtanh.f32 %v1078_v17  ;;  %1481 = vmatpush2.bf16.msra.mxu1 %v3289_v31  ;;  %v2196_v36 = vpop.eup %2195  ;;  %v1190_v17 = vadd.f32 %v3040_v13, %v2712_v40  ;;  %v1180_v13 = vadd.f32 %v2993_v55, %v2712_v40  ;;  %v1184_v31 = vadd.f32 %v3016_v24, %v2712_v40 }
 0x258   : > { %2211 = vtanh.f32 %v1080_v53  ;;  %1493 = vmatprep.subr.bf16.mxu1 %v1433_v46  ;;  %v3137_v1 = vpop.eup %2197  ;;  %v1428_v33 = vpack.c.bf16 %v2196_v36, %v2194_v9 }
 0x259   : > { %2213 = vtanh.f32 %v1082_v63 }
 0x25a   : > { %2215 = vtanh.f32 %v1074_v37  ;;  %1768 = vmatmul.mubr.msk.bf16.vlgmr.msra.gmra.mxu1 %vm1767_vm7, %v3290_v59 }
 0x25b   : > { %2217 = vtanh.f32 %v1068_v20  ;;  %1494 = vmatpush1.bf16.msra.mxu1 %v1432_v5  ;;  %1770 = vmatprep.mubr.msk.bf16.mxu1 %vm1769_vm8, %v3290_v59 }
 0x25c   : > { %2219 = vtanh.f32 %v1070_v4  ;;  %1495 = vmatprep.subr.bf16.mxu1 %v1431_v12  ;;  %v1170_v4 = vadd.f32 %v2971_v39, %v2712_v40  ;;  %v1160_v12 = vadd.f32 %v2951_v26, %v2712_v40 }
 0x25d   : > { %2221 = vtanh.f32 %v1072_v60  ;;  %v1182_v60 = vadd.f32 %v3003_v29, %v2708_v38 }
 0x25e   : > { %2223 = vtanh.f32 %v1064_v6 }
 0x25f   : > { %v2200_v58 = vpop.eup %2199  ;;  %2225 = vtanh.f32 %v1058_v14  ;;  %1496 = vmatpush1.bf16.msra.mxu1 %v1430_v56  ;;  %v3291_v14 = vld [vmem:[#allocation29_spill] sm:$0xff]  ;;  %v3293_v56 = vld [vmem:[#allocation14_spill] sm:$0xff] }
 0x260   : > { %v2202_v10 = vpop.eup %2201  ;;  %2227 = vtanh.f32 %v1060_v57  ;;  %1497 = vmatprep.subr.bf16.mxu1 %v1429_v47  ;;  %v1172_v50 = vadd.f32 %v3291_v14, %v2708_v38  ;;  %v3292_v57 = vld [vmem:[#allocation28_spill] sm:$0xff]  ;;  %v3294_v47 = vld [vmem:[#allocation26_spill] sm:$0xff] }
 0x261   : > { %v2204_v62 = vpop.eup %2203  ;;  %2229 = vtanh.f32 %v1062_v41  ;;  %v1164_v36 = vadd.f32 %v3292_v57, %v2712_v40  ;;  %v3307_v14 = vld [vmem:[#allocation16_spill] sm:$0xff] }
 0x262   : > { %v2206_v25 = vpop.eup %2205  ;;  %2231 = vtanh.f32 %v1054_v23  ;;  %v1427_v0 = vpack.c.bf16 %v2200_v58, %v2204_v62  ;;  %v1150_v23 = vadd.f32 %v3293_v56, %v2712_v40  ;;  %v1158_v58 = vadd.f32 %v3294_v47, %v2708_v38 }
 0x263   : > { %v2208_v44 = vpop.eup %2207  ;;  %2233 = vtanh.f32 %v1048_v7  ;;  %1498 = vmatpush1.bf16.msra.mxu1 %v1428_v33  ;;  %v1426_v53 = vpack.c.bf16 %v2206_v25, %v2202_v10  ;;  %v1162_v10 = vadd.f32 %v3295_v49, %v2708_v38 }
 0x264   : > { %v2210_v8 = vpop.eup %2209  ;;  %2235 = vtanh.f32 %v1050_v35  ;;  %1499 = vmatprep.subr.bf16.mxu1 %v1427_v0 }
 0x265   : > { %v2212_v18 = vpop.eup %2211  ;;  %2237 = vtanh.f32 %v1052_v28  ;;  %v3296_v28 = vld [vmem:[#allocation25_spill] sm:$0xff] }
 0x266   : > { %v2214_v61 = vpop.eup %2213  ;;  %2239 = vtanh.f32 %v1204_v21  ;;  %v1425_v63 = vpack.c.bf16 %v2208_v44, %v2212_v18  ;;  %v1154_v33 = vadd.f32 %v3296_v28, %v2712_v40  ;;  %v1385_v28 = vld [vmem:[#allocation2 + $0x8] sm:$0xff] }
 0x267   : > { %v2216_v54 = vpop.eup %2215  ;;  %2241 = vtanh.f32 %v1190_v17  ;;  %1500 = vmatpush1.bf16.msra.mxu1 %v1426_v53  ;;  %v1424_v3 = vpack.c.bf16 %v2214_v61, %v2210_v8 }
 0x268   : > { %v2218_v37 = vpop.eup %2217  ;;  %2243 = vtanh.f32 %v1198_v15  ;;  %1501 = vmatprep.subr.bf16.mxu1 %v1425_v63 }
 0x269   : > { %v2220_v46 = vpop.eup %2219  ;;  %2245 = vtanh.f32 %v1202_v52 }
 0x26a   : > { %v2222_v20 = vpop.eup %2221  ;;  %2247 = vtanh.f32 %v1194_v51  ;;  %v1423_v55 = vpack.c.bf16 %v2216_v54, %v2220_v46 }
 0x26b   : > { %v2224_v48 = vpop.eup %2223  ;;  %2249 = vtanh.f32 %v1180_v13  ;;  %1502 = vmatpush1.bf16.msra.mxu1 %v1424_v3  ;;  %v1422_v24 = vpack.c.bf16 %v2222_v20, %v2218_v37 }
 0x26c   : > { %v2226_v43 = vpop.eup %2225  ;;  %2251 = vtanh.f32 %v1188_v11  ;;  %1503 = vmatprep.subr.bf16.mxu1 %v1423_v55 }
 0x26d   : > { %v2228_v2 = vpop.eup %2227  ;;  %2253 = vtanh.f32 %v1192_v32 }
 0x26e   : > { %v2230_v5 = vpop.eup %2229  ;;  %2255 = vtanh.f32 %v1184_v31  ;;  %v1421_v39 = vpack.c.bf16 %v2224_v48, %v2228_v2  ;;  %v3298_v2 = vld [vmem:[#allocation23_spill] sm:$0xff] }
 0x26f   : > { %v2232_v6 = vpop.eup %2231  ;;  %2257 = vtanh.f32 %v1170_v4  ;;  %1504 = vmatpush1.bf16.msra.mxu1 %v1422_v24  ;;  %v1420_v42 = vpack.c.bf16 %v2230_v5, %v2226_v43  ;;  %v1348_v43 = vsub.s32 2, %v2699_v34  ;;  %v3300_v24 = vld [vmem:[#allocation22_spill] sm:$0xff]  ;;  %v3301_v5 = vld [vmem:[#allocation20_spill] sm:$0xff] }
 0x270   : > { %v2234_v22 = vpop.eup %2233  ;;  %2259 = vtanh.f32 %v1178_v45  ;;  %1505 = vmatprep.subr.bf16.mxu1 %v1421_v39  ;;  %v3297_v45 = vld [vmem:[#allocation24_spill] sm:$0xff]  ;;  %v2281_v39 = vld [vmem:[%s230_s7] sm:$0xf] }
 0x271   : > { %v2236_v29 = vpop.eup %2235  ;;  %2261 = vtanh.f32 %v1182_v60  ;;  %v3299_v60 = vpack.c.bf16 %v3297_v45, %v3298_v2 }
 0x272   : > { %v2238_v9 = vpop.eup %2237  ;;  %2263 = vtanh.f32 %v1174_v30  ;;  %v1419_v26 = vpack.c.bf16 %v2232_v6, %v2236_v29  ;;  %v3302_v30 = vpack.c.bf16 %v3300_v24, %v3301_v5  ;;  %v1349_v6 = vrot.slane %v2281_v39, %v1348_v43  ;;  %v3306_v29 = vld [vmem:[#allocation18_spill] sm:$0xff] }
 0x273   : > { %v2240_v41 = vpop.eup %2239  ;;  %2265 = vtanh.f32 %v1160_v12  ;;  %1506 = vmatpush1.bf16.msra.mxu1 %v1420_v42  ;;  %v1418_v35 = vpack.c.bf16 %v2238_v9, %v2234_v22  ;;  %v3303_v12 = vld [vmem:[#allocation21_spill] sm:$0xff]  ;;  %v3304_v22 = vld [vmem:[#allocation19_spill] sm:$0xff] }
 0x274   : > { %v2242_v27 = vpop.eup %2241  ;;  %2267 = vtanh.f32 %v1168_v16  ;;  %1507 = vmatprep.subr.bf16.mxu1 %v1419_v26  ;;  %v1449_v25 = vpack.c.bf16 %v2240_v41, %v3137_v1  ;;  %v3305_v16 = vpack.c.bf16 %v3303_v12, %v3304_v22  ;;  %vm1356_vm9 = vcmp.eq.s32.totalorder %v2699_v34, %v1349_v6  ;;  %v3309_v42 = vld [vmem:[#allocation17_spill] sm:$0xff]  ;;  %v3310_v9 = vld [vmem:[#allocation15_spill] sm:$0xff] }
 0x275   : > { %v2244_v7 = vpop.eup %2243  ;;  %2269 = vtanh.f32 %v1172_v50  ;;  %v3308_v50 = vpack.c.bf16 %v3306_v29, %v3307_v14  ;;  %vm1360_vm10 = vcmp.eq.s32.totalorder %v2808_v19, %v1349_v6  ;;  %v3311_v57 = vpack.c.bf16 %v3309_v42, %v3310_v9 }
 0x276   : > { %v2246_v62 = vpop.eup %2245  ;;  %2271 = vtanh.f32 %v1164_v36  ;;  %vm1771_vm11 = vmpackc.low %vm1360_vm10, %vm1356_vm9 }
 0x277   : > { %v2248_v0 = vpop.eup %2247  ;;  %2273 = vtanh.f32 %v1150_v23  ;;  %1508 = vmatpush1.bf16.msra.mxu1 %v1418_v35  ;;  %v1448_v17 = vpack.c.bf16 %v2246_v62, %v2244_v7  ;;  %v1382_v23 = vld [vmem:[#allocation2 + $0x10] sm:$0xff] }
 0x278   : > { %v2250_v21 = vpop.eup %2249  ;;  %2275 = vtanh.f32 %v1158_v58  ;;  %1509 = vmatprep.subr.bf16.mxu1 %v1449_v25  ;;  %v1447_v38 = vpack.c.bf16 %v2248_v0, %v2242_v27  ;;  %v1383_v58 = vld [vmem:[#allocation2] sm:$0xff] }
 0x279   : > { %v2252_v44 = vpop.eup %2251  ;;  %2277 = vtanh.f32 %v1162_v10  ;;  %v1384_v10 = vld [vmem:[#allocation2 + $0x18] sm:$0xff] }
 0x27a   : > { %v2254_v8 = vpop.eup %2253  ;;  %2279 = vtanh.f32 %v1154_v33 }
 0x27b   : > { %v2256_v15 = vpop.eup %2255  ;;  %1510 = vmatpush2.bf16.msra.mxu1 %v1448_v17  ;;  %v1446_v52 = vpack.c.bf16 %v2254_v8, %v2252_v44 }
 0x27c   : > { %v2258_v18 = vpop.eup %2257  ;;  %1511 = vmatprep.subr.bf16.mxu1 %v1447_v38  ;;  %v1445_v1 = vpack.c.bf16 %v2256_v15, %v2250_v21 }
 0x27d   : > { %v2260_v40 = vpop.eup %2259 }
 0x27e   : > { %v2262_v53 = vpop.eup %2261 }
 0x27f   : > { %v2264_v61 = vpop.eup %2263  ;;  %1512 = vmatpush2.bf16.msra.mxu1 %v1446_v52  ;;  %v1444_v54 = vpack.c.bf16 %v2262_v53, %v2260_v40 }
 0x280   : > { %v2266_v51 = vpop.eup %2265  ;;  %1513 = vmatprep.subr.bf16.mxu1 %v1445_v1  ;;  %v1443_v37 = vpack.c.bf16 %v2264_v61, %v2258_v18 }
 0x281   : > { %v2268_v63 = vpop.eup %2267 }
 0x282   : > { %v2270_v13 = vpop.eup %2269 }
 0x283   : > { %v2272_v11 = vpop.eup %2271  ;;  %1514 = vmatpush2.bf16.msra.mxu1 %v1444_v54  ;;  %v1442_v3 = vpack.c.bf16 %v2270_v13, %v2268_v63 }
 0x284   : > { %v2274_v46 = vpop.eup %2273  ;;  %1515 = vmatprep.subr.bf16.mxu1 %v1443_v37  ;;  %v1441_v31 = vpack.c.bf16 %v2272_v11, %v2266_v51 }
 0x285   : > { %v2276_v32 = vpop.eup %2275 }
 0x286   : > { %v2278_v20 = vpop.eup %2277 }
 0x287   : > { %v2280_v55 = vpop.eup %2279  ;;  %1516 = vmatpush2.bf16.msra.mxu1 %v1442_v3  ;;  %v1440_v48 = vpack.c.bf16 %v2278_v20, %v2276_v32 }
 0x288   : > { %1517 = vmatprep.subr.bf16.mxu1 %v1441_v31  ;;  %v1439_v4 = vpack.c.bf16 %v2280_v55, %v2274_v46 }
 0x28b   : > { %1518 = vmatpush2.bf16.msra.mxu1 %v1440_v48 }
 0x28c   : > { %1519 = vmatprep.subr.bf16.mxu1 %v1439_v4 }
 0x28f   : > { %1520 = vmatpush2.bf16.msra.mxu1 %v3299_v60 }
 0x290   : > { %1521 = vmatprep.subr.bf16.mxu1 %v3302_v30 }
 0x293   : > { %1522 = vmatpush2.bf16.msra.mxu1 %v3305_v16 }
 0x294   : > { %1523 = vmatprep.subr.bf16.mxu1 %v3308_v50 }
 0x297   : > { %1524 = vmatpush2.bf16.msra.mxu1 %v3311_v57 }
 0x29a   : > { %1772 = vmatmul.mubr.msk.bf16.vlgmr.msra.gmra.mxu1 %vm1771_vm11, %v3290_v59 }
 0x31a   : > { %v1484_v36 = vpop.f32.mrf.mxu1 }
 0x31c   : > { %v1486_v26 = vpop.f32.mrf.mxu1 }
 0x31e   : > { %v1488_v41 = vpop.f32.mrf.mxu1 }
 0x320   : > { %v1490_v56 = vpop.f32.mrf.mxu1 }
 0x35a   : > { %v1527_v27 = vpop.f32.mrf.mxu1 }
 0x35b   : > { %v1528_v47 = vadd.f32 %v1527_v27, %v1484_v36 }
 0x35c   : > { %v1529_v7 = vpop.f32.mrf.mxu1 }
 0x35d   : > { %v1536_v49 = vadd.f32 %v1528_v47, %v1382_v23  ;;  %v1530_v34 = vadd.f32 %v1529_v7, %v1486_v26 }
 0x35e   : > { %v1531_v19 = vpop.f32.mrf.mxu1 }
 0x35f   : > { %1540 = vst [vmem:[#allocation2 + $0x10] sm:$0xff] %v1536_v49  ;;  %v1537_v35 = vadd.f32 %v1530_v34, %v1383_v58  ;;  %v1532_v62 = vadd.f32 %v1531_v19, %v1488_v41 }
 0x360   : > { %v1533_v33 = vpop.f32.mrf.mxu1 }
 0x361   : > { %1541 = vst [vmem:[#allocation2] sm:$0xff] %v1537_v35  ;;  %v1538_v59 = vadd.f32 %v1532_v62, %v1384_v10  ;;  %v1534_v25 = vadd.f32 %v1533_v33, %v1490_v56  ;;  %1547 = sbr.rel (%p1773_p8) target bundleno = 878 (0x36e), region = 56 }
 0x363   : > { %1542 = vst [vmem:[#allocation2 + $0x18] sm:$0xff] %v1538_v59  ;;  %v1539_v0 = vadd.f32 %v1534_v25, %v1385_v28 }
 0x365   : > { %1543 = vst [vmem:[#allocation2 + $0x8] sm:$0xff] %v1539_v0 }
 0x366   : > { %v1548_v21 = vld [vmem:[#allocation2 + $0x10] sm:$0xff] }
 0x367   : > { %1552 = vst [vmem:[#allocation9] sm:$0xff] %v1548_v21 }
 0x368   : > { %v1549_v44 = vld [vmem:[#allocation2] sm:$0xff] }
 0x369   : > { %1553 = vst [vmem:[#allocation9 + $0x8] sm:$0xff] %v1549_v44 }
 0x36a   : > { %v1550_v17 = vld [vmem:[#allocation2 + $0x18] sm:$0xff] }
 0x36b   : > { %1554 = vst [vmem:[#allocation9 + $0x10] sm:$0xff] %v1550_v17 }
 0x36c   : > { %v1551_v8 = vld [vmem:[#allocation2 + $0x8] sm:$0xff] }
 0x36d   : > { %1555 = vst [vmem:[#allocation9 + $0x18] sm:$0xff] %v1551_v8 }
 0x36e PF: > { %p1839_p13 = scmp.eq.s32.totalorder %s2551_s27, 1  ;;  %s2443_s10 = smov [#allocation9]  }
 0x36f   : > { %s1562_s13 = sshll.u32 %s2443_s10, 4  ;;  %s1563_s13 = int_to_ptr.vmem [resolvable:$true] %s1562_s13 }
 0x370   : > { %s2364_s20 = scalar_lea.vmem %s1563_s13, 512  ;;  %p2371_p12 = scmp.lt.s32.totalorder %s1563_s13, %s1563_s13 }
 0x371   : > { %p2365_p9 = scmp.ne.s32.totalorder %s1563_s13, %s2364_s20  ;;  %p2372_p2 = scmp.lt.s32.totalorder %s2364_s20, %s2364_s20 }
 0x373   : > { %p2366_p11 = pnand %p2365_p9, %p1839_p13  ;;  %p2373_p4 = por %p2372_p2, %p2371_p12 }
 0x375   : > { %p2367_p3 = pneg %p2366_p11 }
 0x377   : > { %p2374_p6 = pnand %p2373_p4, %p2367_p3 }
 0x379   : > { %2377 = shalt.err (!%p2374_p6)
}
 0x37a   : > { %s2444_s21 = smov 256   ;;  %s2445_s23 = smov 16  }
 0x37b   : > { %1822 = dma.vmem_to_hbm [thread:$0]  (%p1839_p13), %s1563_s13, 512, %s3239_s4, [#allocation5], %s2444_s21, %s2444_s21, %s2445_s23  }
 0x37c   : > { %2417 = dma.done.wait (%p1839_p13), [#allocation5], 512  }
 0x37d   : > { %2419 = vsyncadd (%p1839_p13), [#allocation5], 4294966784 }
 0x37e PF: > { %p16_p7 = scmp.ge.s32.totalorder %s2492_s19, 4   ;;  %s3312_s15 = smov %s2426_s16 }
 0x37f   : > { %s3313_s16 = smov %s2430_s17  ;;  %s3314_s17 = smov %s2501_s22 }
 0x380   : > { %s3315_s18 = smov %s2492_s19  ;;  %18 = sbr.rel (!%p16_p7) target bundleno = 5 (0x5), region = 96 }
 0x385   :  { %1578 = vsyncpa [#allocation4], 1 }
 0x386   :  { %1580 = vsyncpa [#allocation4 + $0x1], 1 }
 0x387   :  { %1581 = vsyncpa [#allocation7], 1 }
 0x388   :  { %1582 = vsyncpa [#allocation5], 1 }
 0x389   :  { %1584 = vsyncpa [#allocation5 + $0x1], 1 }

</bundles_post_ra>
